<compile_context>
chip_gen: v7x
topology: tpu7x:2x2x1
jax: 0.10.0
libtpu: 0.0.40
codegen_flags: <defaults>
</compile_context>

<pallas_src>
import jax
import jax.numpy as jnp
from jax import lax
from jax.experimental import pallas as pl
from jax.experimental.pallas import tpu as pltpu

L_IN = 100                 # input length implied by the module (bottleneck = 24*2 = 48)
OUT_PAD = 128              # final layer rows padded to 128 for an aligned in-kernel transpose
MAX_TILE = 512             # batch (lane) tile cap; fits v5e's 16 MiB default scoped VMEM
MXU_DTYPE = jnp.bfloat16   # matmul operand dtype (accumulation is always f32)

_TRANS_B = (((1,), (1,)), ((), ()))   # contract last dims of both operands (a @ b.T)


def _round_up(x, m):
    return ((x + m - 1) // m) * m


def _elementwise_dtype():
    """bf16 tanh/bias path on chips with bf16 VPU/EUP (v6e/v7x), f32 elsewhere."""
    try:
        kind = jax.devices()[0].device_kind.lower()
    except Exception:  # pragma: no cover
        return jnp.float32
    if "v6" in kind or "v7" in kind or "tpu7" in kind:
        return jnp.bfloat16
    return jnp.float32


def _choose_tiling(B, max_tile=MAX_TILE):
    """Largest 128-multiple tile <= max_tile dividing the padded batch,
    preferring >= 2 grid steps so v7x's two TensorCores can both work."""
    b_pad = _round_up(B, 128)
    ntile_min = 2 if b_pad >= 256 else 1
    bt = 128
    for cand in range(128, max_tile + 1, 128):
        if b_pad % cand == 0 and b_pad // cand >= ntile_min:
            bt = cand
    return bt, b_pad


# ---------------------------------------------------------------------------
# The single fused Pallas kernel
# ---------------------------------------------------------------------------
def _make_kernel(ew_dtype):
    def kernel(x_ref,
               w1_ref, b1_ref, w2_ref, b2_ref, w3_ref, b3_ref, w4_ref, b4_ref,
               wf_ref, bf_ref, u2_ref, c2_ref, u3_ref, c3_ref, u4_ref, c4_ref,
               u5_ref, c5_ref, out_ref):
        """Whole autoencoder forward on one (batch-tile, 100) slab.

        Internal activation layout is (features, batch_tile): batch on lanes,
        so bias/tanh/max are fully lane-dense.  MXU accumulates in f32; the
        elementwise epilogue runs in `ew_dtype` (bf16 on v6e/v7x, f32 on v5e).
        """

        def dense(w_ref, h):
            return jnp.dot(w_ref[...], h.astype(w_ref.dtype),
                           preferred_element_type=jnp.float32)

        def act(z, b_ref):
            return jnp.tanh((z + b_ref[...]).astype(ew_dtype))

        def pooled(z, b_ref, half):
            # tanh is monotone -> max(tanh a, tanh b) == tanh(max(a, b));
            # bias is constant per channel so it can be added after the max.
            return act(jnp.maximum(z[:half], z[half:2 * half]), b_ref)

        # ---- encoder ----
        # layer 1 (conv1 + tanh + maxpool fused): contract on the feature axis
        # of the natural (bt, 100) input block -> no wrapper / in-kernel
        # transpose needed on the way in.
        xb = x_ref[...].astype(w1_ref.dtype)                       # (bt, 100)
        z1 = lax.dot_general(w1_ref[...], xb, _TRANS_B,
                             preferred_element_type=jnp.float32)   # (128, bt)
        h = pooled(z1, b1_ref, 64)                                 # (64,  bt)
        h = pooled(dense(w2_ref, h), b2_ref, 48)                   # (48,  bt)
        h = act(dense(w3_ref, h), b3_ref)                          # (64,  bt)
        h = act(dense(w4_ref, h), b4_ref)                          # (48,  bt)

        # ---- bottleneck + first deconv, folded into one matrix at pack time
        #      (fc_e -> fc_d -> deconv1 has no nonlinearity in between) ----
        h = act(dense(wf_ref, h), bf_ref)                          # (64,  bt)

        # ---- decoder: ConvTranspose1d + Tanh ----
        h = act(dense(u2_ref, h), c2_ref)                          # (64,  bt)
        h = act(dense(u3_ref, h), c3_ref)                          # (120, bt)
        h = act(dense(u4_ref, h), c4_ref)                          # (184, bt)

        # final deconv: rows padded to 128 so the f32 result transpose back to
        # the natural (bt, features) layout is (8,128)-aligned XLU work.
        z5 = dense(u5_ref, h) + c5_ref[...]                        # (128, bt) f32
        zt = jnp.transpose(z5)                                     # (bt, 128)
        out_ref[...] = jnp.tanh(zt[:, :L_IN]).astype(out_ref.dtype)

    return kernel


def _cost_estimate(packed, b_pad):
    mats = packed[0::2]
    flops = 2 * sum(int(m.shape[0]) * int(m.shape[1]) for m in mats) * int(b_pad)
    transcendentals = (64 + 48 + 64 + 48 + 64 + 64 + 120 + 184 + L_IN) * int(b_pad)
    weight_bytes = sum(int(a.size) * a.dtype.itemsize for a in packed)
    bytes_accessed = 2 * L_IN * 4 * int(b_pad) + weight_bytes
    return pl.CostEstimate(flops=flops, transcendentals=transcendentals,
                           bytes_accessed=bytes_accessed)


def forward(packed, x, *, max_tile=MAX_TILE):
    """x: (B, 1, 100) float32 -> (B, 1, 100) float32."""
    B = x.shape[0]
    assert x.shape[1] == 1 and x.shape[2] == L_IN, x.shape

    bt, b_pad = _choose_tiling(B, max_tile)
    n_tiles = b_pad // bt

    xs = x.reshape(B, L_IN).astype(jnp.float32)        # free reshape, natural layout
    if b_pad != B:
        xs = jnp.pad(xs, ((0, b_pad - B), (0, 0)))     # only when B % bt != 0

    ew_dtype = _elementwise_dtype()
    kernel = _make_kernel(ew_dtype)
    weight_specs = [pl.BlockSpec(a.shape, lambda i: (0, 0)) for a in packed]

    out = pl.pallas_call(
        kernel,
        grid=(n_tiles,),
        in_specs=[pl.BlockSpec((bt, L_IN), lambda i: (i, 0))] + weight_specs,
        out_specs=pl.BlockSpec((bt, L_IN), lambda i: (i, 0)),
        out_shape=jax.ShapeDtypeStruct((b_pad, L_IN), jnp.float32),
        compiler_params=pltpu.CompilerParams(
            dimension_semantics=("parallel",)),          # megacore sharding on v7x
        cost_estimate=_cost_estimate(packed, b_pad),
    )(xs, *packed)

    return out[:B].reshape(B, 1, L_IN)


# ---------------------------------------------------------------------------
# One-time parameter lowering: conv / conv-transpose -> dense matrices
# (channel-major flattened features; done once, outside the forward pass)
# ---------------------------------------------------------------------------
def _conv_dense(w, b, lin, stride):
    """PyTorch Conv1d weight (Cout, Cin, K) -> dense (Cout*Lout, Cin*Lin)."""
    cout, cin, k = w.shape
    lout = (lin - k) // stride + 1
    co = jnp.arange(cout).reshape(cout, 1, 1, 1)
    lo = jnp.arange(lout).reshape(1, lout, 1, 1)
    ci = jnp.arange(cin).reshape(1, 1, cin, 1)
    kk = jnp.arange(k).reshape(1, 1, 1, k)
    shp = (cout, lout, cin, k)
    rows = jnp.broadcast_to(co * lout + lo, shp).ravel()
    cols = jnp.broadcast_to(ci * lin + lo * stride + kk, shp).ravel()
    vals = jnp.broadcast_to(w[:, None, :, :], shp).ravel().astype(jnp.float32)
    m = jnp.zeros((cout * lout, cin * lin), jnp.float32).at[rows, cols].set(vals)
    bias = jnp.repeat(b.astype(jnp.float32), lout).reshape(cout * lout, 1)
    return m, bias, cout, lout


def _deconv_dense(w, b, lin, stride):
    """PyTorch ConvTranspose1d weight (Cin, Cout, K) -> dense (Cout*Lout, Cin*Lin)."""
    cin, cout, k = w.shape
    lout = (lin - 1) * stride + k
    ci = jnp.arange(cin).reshape(cin, 1, 1, 1)
    co = jnp.arange(cout).reshape(1, cout, 1, 1)
    li = jnp.arange(lin).reshape(1, 1, lin, 1)
    kk = jnp.arange(k).reshape(1, 1, 1, k)
    shp = (cin, cout, lin, k)
    rows = jnp.broadcast_to(co * lout + li * stride + kk, shp).ravel()
    cols = jnp.broadcast_to(ci * lin + li, shp).ravel()
    vals = jnp.broadcast_to(w[:, :, None, :], shp).ravel().astype(jnp.float32)
    m = jnp.zeros((cout * lout, cin * lin), jnp.float32).at[rows, cols].set(vals)
    bias = jnp.repeat(b.astype(jnp.float32), lout).reshape(cout * lout, 1)
    return m, bias, lout


def _pool_split(m, bias, cout, lout):
    """Split a conv dense matrix into even/odd output positions (fused MaxPool1d(2)).
    NOTE: keeping only the even-position bias is valid because the bias is
    constant per channel across positions (jnp.repeat above)."""
    lh = lout // 2
    fin = m.shape[1]
    m3 = m.reshape(cout, lout, fin)
    m_even = m3[:, 0::2, :].reshape(cout * lh, fin)
    m_odd = m3[:, 1::2, :].reshape(cout * lh, fin)
    bias_p = bias.reshape(cout, lout, 1)[:, 0::2, :].reshape(cout * lh, 1)
    return m_even, m_odd, bias_p


def pack_params(p):
    """Lower raw PyTorch-layout parameters to the kernel-ready layout (once)."""
    # encoder (pooled layers stacked even||odd into a single matmul each)
    m1, b1, c1, l1 = _conv_dense(p["e1_w"], p["e1_b"], lin=L_IN, stride=3)     # (128,100)
    w1e, w1o, b1p = _pool_split(m1, b1, c1, l1)
    w1 = jnp.concatenate([w1e, w1o], axis=0)                                   # (128,100)
    m2, b2, c2, l2 = _conv_dense(p["e2_w"], p["e2_b"], lin=l1 // 2, stride=1)  # (96,64)
    w2e, w2o, b2p = _pool_split(m2, b2, c2, l2)
    w2 = jnp.concatenate([w2e, w2o], axis=0)                                   # (96,64)
    m3, b3, _, l3 = _conv_dense(p["e3_w"], p["e3_b"], lin=l2 // 2, stride=1)   # (64,48)
    m4, b4, _, l4 = _conv_dense(p["e4_w"], p["e4_b"], lin=l3, stride=1)        # (48,64)
    assert l4 == 2

    # fold fc_e -> fc_d -> deconv1 (activation-free) into one matrix, in f32
    we = p["fe_w"].astype(jnp.float32)
    be = p["fe_b"].astype(jnp.float32).reshape(-1, 1)
    wd = p["fd_w"].astype(jnp.float32)
    bd = p["fd_b"].astype(jnp.float32).reshape(-1, 1)
    d1, db1, dl1 = _deconv_dense(p["d1_w"], p["d1_b"], lin=l4, stride=1)       # (64,48)
    wfold = d1 @ (wd @ we)                                                     # (64,48)
    bfold = d1 @ (wd @ be + bd) + db1                                          # (64,1)

    # remaining decoder conv-transposes
    d2, db2, dl2 = _deconv_dense(p["d2_w"], p["d2_b"], lin=dl1, stride=1)      # (64,64)
    d3, db3, dl3 = _deconv_dense(p["d3_w"], p["d3_b"], lin=dl2, stride=2)      # (120,64)
    d4, db4, dl4 = _deconv_dense(p["d4_w"], p["d4_b"], lin=dl3, stride=2)      # (184,120)
    d5, db5, dl5 = _deconv_dense(p["d5_w"], p["d5_b"], lin=dl4, stride=2)      # (100,184)
    assert dl5 == L_IN
    # pad final layer to 128 rows so the in-kernel result transpose is aligned
    d5p = jnp.zeros((OUT_PAD, d5.shape[1]), jnp.float32).at[:L_IN, :].set(d5)
    c5p = jnp.zeros((OUT_PAD, 1), jnp.float32).at[:L_IN, :].set(db5)

    def _cast(m):
        return m.astype(MXU_DTYPE)

    # Order must match _make_kernel's argument order (after x_ref): (w, b) pairs.
    return (_cast(w1), b1p, _cast(w2), b2p, _cast(m3), b3, _cast(m4), b4,
            _cast(wfold), bfold, _cast(d2), db2, _cast(d3), db3,
            _cast(d4), db4, _cast(d5p), c5p)


# ---------------------------------------------------------------------------
# Parameters (deterministic synthetic init, PyTorch-style uniform 1/sqrt(fan_in))
# ---------------------------------------------------------------------------
def _u(key, shape, fan_in):
    bound = 1.0 / jnp.sqrt(jnp.float32(fan_in))
    return jax.random.uniform(key, shape, jnp.float32, -bound, bound)


def init_params(key):
    ks = jax.random.split(key, 22)
    p = {}
    # encoder convs: (Cout, Cin, K)
    p["e1_w"] = _u(ks[0], (4, 1, 7), 1 * 7);     p["e1_b"] = _u(ks[1], (4,), 1 * 7)
    p["e2_w"] = _u(ks[2], (8, 4, 5), 4 * 5);     p["e2_b"] = _u(ks[3], (8,), 4 * 5)
    p["e3_w"] = _u(ks[4], (16, 8, 3), 8 * 3);    p["e3_b"] = _u(ks[5], (16,), 8 * 3)
    p["e4_w"] = _u(ks[6], (24, 16, 3), 16 * 3);  p["e4_b"] = _u(ks[7], (24,), 16 * 3)
    # fc layers: (out, in)
    p["fe_w"] = _u(ks[8], (32, 48), 48);         p["fe_b"] = _u(ks[9], (32,), 48)
    p["fd_w"] = _u(ks[10], (48, 32), 32);        p["fd_b"] = _u(ks[11], (48,), 32)
    # decoder transposed convs: (Cin, Cout, K)
    p["d1_w"] = _u(ks[12], (24, 16, 3), 24 * 3); p["d1_b"] = _u(ks[13], (16,), 24 * 3)
    p["d2_w"] = _u(ks[14], (16, 8, 5), 16 * 5);  p["d2_b"] = _u(ks[15], (8,), 16 * 5)
    p["d3_w"] = _u(ks[16], (8, 6, 6), 8 * 6);    p["d3_b"] = _u(ks[17], (6,), 8 * 6)
    p["d4_w"] = _u(ks[18], (6, 4, 8), 6 * 8);    p["d4_b"] = _u(ks[19], (4,), 6 * 8)
    p["d5_w"] = _u(ks[20], (4, 1, 10), 4 * 10);  p["d5_b"] = _u(ks[21], (1,), 4 * 10)
    return p


# ---------------------------------------------------------------------------
# Plain-JAX f32 reference (matches PyTorch layer semantics) for a sanity check
# ---------------------------------------------------------------------------
def _ref_conv1d(x, w, b, stride):
    B, Cin, Lin = x.shape
    Cout, _, K = w.shape
    Lout = (Lin - K) // stride + 1
    idx = jnp.arange(Lout)[:, None] * stride + jnp.arange(K)[None, :]
    patches = x[:, :, idx]                                     # (B, Cin, Lout, K)
    return jnp.einsum("bclk,ock->bol", patches, w) + b[None, :, None]


def _ref_deconv1d(x, w, b, stride):
    B, Cin, Lin = x.shape
    _, Cout, K = w.shape
    Ldil = (Lin - 1) * stride + 1
    xd = jnp.zeros((B, Cin, Ldil), x.dtype).at[:, :, ::stride].set(x)
    xp = jnp.pad(xd, ((0, 0), (0, 0), (K - 1, K - 1)))
    wf = jnp.flip(w, axis=2).transpose(1, 0, 2)                # (Cout, Cin, K)
    return _ref_conv1d(xp, wf, b, 1)


def _ref_forward(p, x):
    h = jnp.tanh(_ref_conv1d(x, p["e1_w"], p["e1_b"], 3))
    h = jnp.maximum(h[:, :, 0::2], h[:, :, 1::2])
    h = jnp.tanh(_ref_conv1d(h, p["e2_w"], p["e2_b"], 1))
    h = jnp.maximum(h[:, :, 0::2], h[:, :, 1::2])
    h = jnp.tanh(_ref_conv1d(h, p["e3_w"], p["e3_b"], 1))
    h = jnp.tanh(_ref_conv1d(h, p["e4_w"], p["e4_b"], 1))
    m = h.reshape(h.shape[0], 48)
    m = m @ p["fe_w"].T + p["fe_b"]
    m = m @ p["fd_w"].T + p["fd_b"]
    d = m.reshape(-1, 24, 2)
    d = jnp.tanh(_ref_deconv1d(d, p["d1_w"], p["d1_b"], 1))
    d = jnp.tanh(_ref_deconv1d(d, p["d2_w"], p["d2_b"], 1))
    d = jnp.tanh(_ref_deconv1d(d, p["d3_w"], p["d3_b"], 2))
    d = jnp.tanh(_ref_deconv1d(d, p["d4_w"], p["d4_b"], 2))
    d = jnp.tanh(_ref_deconv1d(d, p["d5_w"], p["d5_b"], 2))
    return d


if __name__ == "__main__":
    key = jax.random.PRNGKey(0)
    pkey, xkey = jax.random.split(key)
    raw = init_params(pkey)
    packed = pack_params(raw)                       # one-time weight lowering
    x = jax.random.normal(xkey, (2, 1, L_IN), jnp.float32)

    y = jax.block_until_ready(jax.jit(forward)(packed, x))
    assert y.shape == (2, 1, L_IN), y.shape
    assert bool(jnp.all(jnp.isfinite(y)))

    # Tighter tolerance than before: bf16 MXU operands (+ bf16 epilogue on
    # v6e/v7x) against the f32 reference through 11 contracting tanh layers.
    y_ref = _ref_forward(raw, x)
    err = float(jnp.max(jnp.abs(y - y_ref)))
    assert err < 5e-2, err

    print("KERNEL_OK")
</pallas_src>

<mosaic_0001>
module attributes {stable_mosaic.version = 11 : i64} {
  func.func @kernel(%arg0: i32, %arg1: memref<128x100xf32, #tpu.memory_space<vmem>>, %arg2: memref<128x100xbf16, #tpu.memory_space<vmem>>, %arg3: memref<64x1xf32, #tpu.memory_space<vmem>>, %arg4: memref<96x64xbf16, #tpu.memory_space<vmem>>, %arg5: memref<48x1xf32, #tpu.memory_space<vmem>>, %arg6: memref<64x48xbf16, #tpu.memory_space<vmem>>, %arg7: memref<64x1xf32, #tpu.memory_space<vmem>>, %arg8: memref<48x64xbf16, #tpu.memory_space<vmem>>, %arg9: memref<48x1xf32, #tpu.memory_space<vmem>>, %arg10: memref<64x48xbf16, #tpu.memory_space<vmem>>, %arg11: memref<64x1xf32, #tpu.memory_space<vmem>>, %arg12: memref<64x64xbf16, #tpu.memory_space<vmem>>, %arg13: memref<64x1xf32, #tpu.memory_space<vmem>>, %arg14: memref<120x64xbf16, #tpu.memory_space<vmem>>, %arg15: memref<120x1xf32, #tpu.memory_space<vmem>>, %arg16: memref<184x120xbf16, #tpu.memory_space<vmem>>, %arg17: memref<184x1xf32, #tpu.memory_space<vmem>>, %arg18: memref<128x184xbf16, #tpu.memory_space<vmem>>, %arg19: memref<128x1xf32, #tpu.memory_space<vmem>>, %arg20: memref<128x100xf32, #tpu.memory_space<vmem>>) attributes {dimension_semantics = [#tpu.dimension_semantics<parallel>], iteration_bounds = array<i64: 1>, scalar_prefetch = 0 : i64, scratch_operands = 0 : i64, tpu.core_type = #tpu.core_type<tc>, window_params = [{transform_indices = @transform_0, window_bounds = array<i64: 128, 100>}, {pipeline_mode = #tpu.pipeline_mode<synchronous>, transform_indices = @transform_1, window_bounds = array<i64: 128, 100>}, {pipeline_mode = #tpu.pipeline_mode<synchronous>, transform_indices = @transform_2, window_bounds = array<i64: 64, 1>}, {pipeline_mode = #tpu.pipeline_mode<synchronous>, transform_indices = @transform_3, window_bounds = array<i64: 96, 64>}, {pipeline_mode = #tpu.pipeline_mode<synchronous>, transform_indices = @transform_4, window_bounds = array<i64: 48, 1>}, {pipeline_mode = #tpu.pipeline_mode<synchronous>, transform_indices = @transform_5, window_bounds = array<i64: 64, 48>}, {pipeline_mode = #tpu.pipeline_mode<synchronous>, transform_indices = @transform_6, window_bounds = array<i64: 64, 1>}, {pipeline_mode = #tpu.pipeline_mode<synchronous>, transform_indices = @transform_7, window_bounds = array<i64: 48, 64>}, {pipeline_mode = #tpu.pipeline_mode<synchronous>, transform_indices = @transform_8, window_bounds = array<i64: 48, 1>}, {pipeline_mode = #tpu.pipeline_mode<synchronous>, transform_indices = @transform_9, window_bounds = array<i64: 64, 48>}, {pipeline_mode = #tpu.pipeline_mode<synchronous>, transform_indices = @transform_10, window_bounds = array<i64: 64, 1>}, {pipeline_mode = #tpu.pipeline_mode<synchronous>, transform_indices = @transform_11, window_bounds = array<i64: 64, 64>}, {pipeline_mode = #tpu.pipeline_mode<synchronous>, transform_indices = @transform_12, window_bounds = array<i64: 64, 1>}, {pipeline_mode = #tpu.pipeline_mode<synchronous>, transform_indices = @transform_13, window_bounds = array<i64: 120, 64>}, {pipeline_mode = #tpu.pipeline_mode<synchronous>, transform_indices = @transform_14, window_bounds = array<i64: 120, 1>}, {pipeline_mode = #tpu.pipeline_mode<synchronous>, transform_indices = @transform_15, window_bounds = array<i64: 184, 120>}, {pipeline_mode = #tpu.pipeline_mode<synchronous>, transform_indices = @transform_16, window_bounds = array<i64: 184, 1>}, {pipeline_mode = #tpu.pipeline_mode<synchronous>, transform_indices = @transform_17, window_bounds = array<i64: 128, 184>}, {pipeline_mode = #tpu.pipeline_mode<synchronous>, transform_indices = @transform_18, window_bounds = array<i64: 128, 1>}, {transform_indices = @transform_19, window_bounds = array<i64: 128, 100>}]} {
    %c0 = arith.constant 0 : index
    %c0_0 = arith.constant 0 : index
    %0 = vector.load %arg1[%c0, %c0_0] : memref<128x100xf32, #tpu.memory_space<vmem>>, vector<128x100xf32>
    %1 = arith.truncf %0 : vector<128x100xf32> to vector<128x100xbf16>
    %c0_1 = arith.constant 0 : index
    %c0_2 = arith.constant 0 : index
    %2 = vector.load %arg2[%c0_1, %c0_2] : memref<128x100xbf16, #tpu.memory_space<vmem>>, vector<128x100xbf16>
    %cst = arith.constant dense<0.000000e+00> : vector<128x128xf32>
    %3 = tpu.matmul %2, %1, %cst {dimension_numbers = #tpu.dot_dimension_numbers<[1], [1], [0], [0], [0, 0, 1, 0], [], []>} : vector<128x100xbf16>, vector<128x100xbf16>, vector<128x128xf32> -> vector<128x128xf32>
    %4 = vector.extract_strided_slice %3 {offsets = [0, 0], sizes = [64, 128], strides = [1, 1]} : vector<128x128xf32> to vector<64x128xf32>
    %5 = vector.extract_strided_slice %3 {offsets = [64, 0], sizes = [64, 128], strides = [1, 1]} : vector<128x128xf32> to vector<64x128xf32>
    %6 = arith.maximumf %4, %5 : vector<64x128xf32>
    %c0_3 = arith.constant 0 : index
    %c0_4 = arith.constant 0 : index
    %7 = vector.load %arg3[%c0_3, %c0_4] : memref<64x1xf32, #tpu.memory_space<vmem>>, vector<64x1xf32>
    %8 = vector.broadcast %7 : vector<64x1xf32> to vector<64x128xf32>
    %9 = arith.addf %6, %8 : vector<64x128xf32>
    %10 = math.tanh %9 : vector<64x128xf32>
    %c0_5 = arith.constant 0 : index
    %c0_6 = arith.constant 0 : index
    %11 = vector.load %arg4[%c0_5, %c0_6] : memref<96x64xbf16, #tpu.memory_space<vmem>>, vector<96x64xbf16>
    %12 = arith.truncf %10 : vector<64x128xf32> to vector<64x128xbf16>
    %cst_7 = arith.constant dense<0.000000e+00> : vector<96x128xf32>
    %13 = tpu.matmul %11, %12, %cst_7 {dimension_numbers = #tpu.dot_dimension_numbers<[1], [0], [0], [1], [0, 0, 1, 1], [], []>} : vector<96x64xbf16>, vector<64x128xbf16>, vector<96x128xf32> -> vector<96x128xf32>
    %14 = vector.extract_strided_slice %13 {offsets = [0, 0], sizes = [48, 128], strides = [1, 1]} : vector<96x128xf32> to vector<48x128xf32>
    %15 = vector.extract_strided_slice %13 {offsets = [48, 0], sizes = [48, 128], strides = [1, 1]} : vector<96x128xf32> to vector<48x128xf32>
    %16 = arith.maximumf %14, %15 : vector<48x128xf32>
    %c0_8 = arith.constant 0 : index
    %c0_9 = arith.constant 0 : index
    %17 = vector.load %arg5[%c0_8, %c0_9] : memref<48x1xf32, #tpu.memory_space<vmem>>, vector<48x1xf32>
    %18 = vector.broadcast %17 : vector<48x1xf32> to vector<48x128xf32>
    %19 = arith.addf %16, %18 : vector<48x128xf32>
    %20 = math.tanh %19 : vector<48x128xf32>
    %c0_10 = arith.constant 0 : index
    %c0_11 = arith.constant 0 : index
    %21 = vector.load %arg6[%c0_10, %c0_11] : memref<64x48xbf16, #tpu.memory_space<vmem>>, vector<64x48xbf16>
    %22 = arith.truncf %20 : vector<48x128xf32> to vector<48x128xbf16>
    %cst_12 = arith.constant dense<0.000000e+00> : vector<64x128xf32>
    %23 = tpu.matmul %21, %22, %cst_12 {dimension_numbers = #tpu.dot_dimension_numbers<[1], [0], [0], [1], [0, 0, 1, 1], [], []>} : vector<64x48xbf16>, vector<48x128xbf16>, vector<64x128xf32> -> vector<64x128xf32>
    %c0_13 = arith.constant 0 : index
    %c0_14 = arith.constant 0 : index
    %24 = vector.load %arg7[%c0_13, %c0_14] : memref<64x1xf32, #tpu.memory_space<vmem>>, vector<64x1xf32>
    %25 = vector.broadcast %24 : vector<64x1xf32> to vector<64x128xf32>
    %26 = arith.addf %23, %25 : vector<64x128xf32>
    %27 = math.tanh %26 : vector<64x128xf32>
    %c0_15 = arith.constant 0 : index
    %c0_16 = arith.constant 0 : index
    %28 = vector.load %arg8[%c0_15, %c0_16] : memref<48x64xbf16, #tpu.memory_space<vmem>>, vector<48x64xbf16>
    %29 = arith.truncf %27 : vector<64x128xf32> to vector<64x128xbf16>
    %cst_17 = arith.constant dense<0.000000e+00> : vector<48x128xf32>
    %30 = tpu.matmul %28, %29, %cst_17 {dimension_numbers = #tpu.dot_dimension_numbers<[1], [0], [0], [1], [0, 0, 1, 1], [], []>} : vector<48x64xbf16>, vector<64x128xbf16>, vector<48x128xf32> -> vector<48x128xf32>
    %c0_18 = arith.constant 0 : index
    %c0_19 = arith.constant 0 : index
    %31 = vector.load %arg9[%c0_18, %c0_19] : memref<48x1xf32, #tpu.memory_space<vmem>>, vector<48x1xf32>
    %32 = vector.broadcast %31 : vector<48x1xf32> to vector<48x128xf32>
    %33 = arith.addf %30, %32 : vector<48x128xf32>
    %34 = math.tanh %33 : vector<48x128xf32>
    %c0_20 = arith.constant 0 : index
    %c0_21 = arith.constant 0 : index
    %35 = vector.load %arg10[%c0_20, %c0_21] : memref<64x48xbf16, #tpu.memory_space<vmem>>, vector<64x48xbf16>
    %36 = arith.truncf %34 : vector<48x128xf32> to vector<48x128xbf16>
    %cst_22 = arith.constant dense<0.000000e+00> : vector<64x128xf32>
    %37 = tpu.matmul %35, %36, %cst_22 {dimension_numbers = #tpu.dot_dimension_numbers<[1], [0], [0], [1], [0, 0, 1, 1], [], []>} : vector<64x48xbf16>, vector<48x128xbf16>, vector<64x128xf32> -> vector<64x128xf32>
    %c0_23 = arith.constant 0 : index
    %c0_24 = arith.constant 0 : index
    %38 = vector.load %arg11[%c0_23, %c0_24] : memref<64x1xf32, #tpu.memory_space<vmem>>, vector<64x1xf32>
    %39 = vector.broadcast %38 : vector<64x1xf32> to vector<64x128xf32>
    %40 = arith.addf %37, %39 : vector<64x128xf32>
    %41 = math.tanh %40 : vector<64x128xf32>
    %c0_25 = arith.constant 0 : index
    %c0_26 = arith.constant 0 : index
    %42 = vector.load %arg12[%c0_25, %c0_26] : memref<64x64xbf16, #tpu.memory_space<vmem>>, vector<64x64xbf16>
    %43 = arith.truncf %41 : vector<64x128xf32> to vector<64x128xbf16>
    %cst_27 = arith.constant dense<0.000000e+00> : vector<64x128xf32>
    %44 = tpu.matmul %42, %43, %cst_27 {dimension_numbers = #tpu.dot_dimension_numbers<[1], [0], [0], [1], [0, 0, 1, 1], [], []>} : vector<64x64xbf16>, vector<64x128xbf16>, vector<64x128xf32> -> vector<64x128xf32>
    %c0_28 = arith.constant 0 : index
    %c0_29 = arith.constant 0 : index
    %45 = vector.load %arg13[%c0_28, %c0_29] : memref<64x1xf32, #tpu.memory_space<vmem>>, vector<64x1xf32>
    %46 = vector.broadcast %45 : vector<64x1xf32> to vector<64x128xf32>
    %47 = arith.addf %44, %46 : vector<64x128xf32>
    %48 = math.tanh %47 : vector<64x128xf32>
    %c0_30 = arith.constant 0 : index
    %c0_31 = arith.constant 0 : index
    %49 = vector.load %arg14[%c0_30, %c0_31] : memref<120x64xbf16, #tpu.memory_space<vmem>>, vector<120x64xbf16>
    %50 = arith.truncf %48 : vector<64x128xf32> to vector<64x128xbf16>
    %cst_32 = arith.constant dense<0.000000e+00> : vector<120x128xf32>
    %51 = tpu.matmul %49, %50, %cst_32 {dimension_numbers = #tpu.dot_dimension_numbers<[1], [0], [0], [1], [0, 0, 1, 1], [], []>} : vector<120x64xbf16>, vector<64x128xbf16>, vector<120x128xf32> -> vector<120x128xf32>
    %c0_33 = arith.constant 0 : index
    %c0_34 = arith.constant 0 : index
    %52 = vector.load %arg15[%c0_33, %c0_34] : memref<120x1xf32, #tpu.memory_space<vmem>>, vector<120x1xf32>
    %53 = vector.broadcast %52 : vector<120x1xf32> to vector<120x128xf32>
    %54 = arith.addf %51, %53 : vector<120x128xf32>
    %55 = math.tanh %54 : vector<120x128xf32>
    %c0_35 = arith.constant 0 : index
    %c0_36 = arith.constant 0 : index
    %56 = vector.load %arg16[%c0_35, %c0_36] : memref<184x120xbf16, #tpu.memory_space<vmem>>, vector<184x120xbf16>
    %57 = arith.truncf %55 : vector<120x128xf32> to vector<120x128xbf16>
    %cst_37 = arith.constant dense<0.000000e+00> : vector<184x128xf32>
    %58 = tpu.matmul %56, %57, %cst_37 {dimension_numbers = #tpu.dot_dimension_numbers<[1], [0], [0], [1], [0, 0, 1, 1], [], []>} : vector<184x120xbf16>, vector<120x128xbf16>, vector<184x128xf32> -> vector<184x128xf32>
    %c0_38 = arith.constant 0 : index
    %c0_39 = arith.constant 0 : index
    %59 = vector.load %arg17[%c0_38, %c0_39] : memref<184x1xf32, #tpu.memory_space<vmem>>, vector<184x1xf32>
    %60 = vector.broadcast %59 : vector<184x1xf32> to vector<184x128xf32>
    %61 = arith.addf %58, %60 : vector<184x128xf32>
    %62 = math.tanh %61 : vector<184x128xf32>
    %c0_40 = arith.constant 0 : index
    %c0_41 = arith.constant 0 : index
    %63 = vector.load %arg18[%c0_40, %c0_41] : memref<128x184xbf16, #tpu.memory_space<vmem>>, vector<128x184xbf16>
    %64 = arith.truncf %62 : vector<184x128xf32> to vector<184x128xbf16>
    %cst_42 = arith.constant dense<0.000000e+00> : vector<128x128xf32>
    %65 = tpu.matmul %63, %64, %cst_42 {dimension_numbers = #tpu.dot_dimension_numbers<[1], [0], [0], [1], [0, 0, 1, 1], [], []>} : vector<128x184xbf16>, vector<184x128xbf16>, vector<128x128xf32> -> vector<128x128xf32>
    %c0_43 = arith.constant 0 : index
    %c0_44 = arith.constant 0 : index
    %66 = vector.load %arg19[%c0_43, %c0_44] : memref<128x1xf32, #tpu.memory_space<vmem>>, vector<128x1xf32>
    %67 = vector.broadcast %66 : vector<128x1xf32> to vector<128x128xf32>
    %68 = arith.addf %65, %67 : vector<128x128xf32>
    %69 = tpu.transpose %68, [1, 0] : vector<128x128xf32> -> vector<128x128xf32>
    %70 = vector.extract_strided_slice %69 {offsets = [0, 0], sizes = [128, 100], strides = [1, 1]} : vector<128x128xf32> to vector<128x100xf32>
    %71 = math.tanh %70 : vector<128x100xf32>
    %c0_45 = arith.constant 0 : index
    %c0_46 = arith.constant 0 : index
    %72 = vector.load %arg20[%c0_45, %c0_46] : memref<128x100xf32, #tpu.memory_space<vmem>>, vector<128x100xf32>
    tpu.vector_store %arg20[%c0_45, %c0_46], %71 {strides = array<i32>} : memref<128x100xf32, #tpu.memory_space<vmem>>, vector<128x100xf32>,
    return
  }
  func.func @transform_0(%arg0: i32) -> (i32, i32) {
    %c0_i32 = arith.constant 0 : i32
    %c0_i32_0 = arith.constant 0 : i32
    return %arg0, %c0_i32 : i32, i32
  }
  func.func @transform_1(%arg0: i32) -> (i32, i32) {
    %c0_i32 = arith.constant 0 : i32
    %c0_i32_0 = arith.constant 0 : i32
    %c0_i32_1 = arith.constant 0 : i32
    return %c0_i32, %c0_i32_0 : i32, i32
  }
  func.func @transform_2(%arg0: i32) -> (i32, i32) {
    %c0_i32 = arith.constant 0 : i32
    %c0_i32_0 = arith.constant 0 : i32
    %c0_i32_1 = arith.constant 0 : i32
    return %c0_i32, %c0_i32_0 : i32, i32
  }
  func.func @transform_3(%arg0: i32) -> (i32, i32) {
    %c0_i32 = arith.constant 0 : i32
    %c0_i32_0 = arith.constant 0 : i32
    %c0_i32_1 = arith.constant 0 : i32
    return %c0_i32, %c0_i32_0 : i32, i32
  }
  func.func @transform_4(%arg0: i32) -> (i32, i32) {
    %c0_i32 = arith.constant 0 : i32
    %c0_i32_0 = arith.constant 0 : i32
    %c0_i32_1 = arith.constant 0 : i32
    return %c0_i32, %c0_i32_0 : i32, i32
  }
  func.func @transform_5(%arg0: i32) -> (i32, i32) {
    %c0_i32 = arith.constant 0 : i32
    %c0_i32_0 = arith.constant 0 : i32
    %c0_i32_1 = arith.constant 0 : i32
    return %c0_i32, %c0_i32_0 : i32, i32
  }
  func.func @transform_6(%arg0: i32) -> (i32, i32) {
    %c0_i32 = arith.constant 0 : i32
    %c0_i32_0 = arith.constant 0 : i32
    %c0_i32_1 = arith.constant 0 : i32
    return %c0_i32, %c0_i32_0 : i32, i32
  }
  func.func @transform_7(%arg0: i32) -> (i32, i32) {
    %c0_i32 = arith.constant 0 : i32
    %c0_i32_0 = arith.constant 0 : i32
    %c0_i32_1 = arith.constant 0 : i32
    return %c0_i32, %c0_i32_0 : i32, i32
  }
  func.func @transform_8(%arg0: i32) -> (i32, i32) {
    %c0_i32 = arith.constant 0 : i32
    %c0_i32_0 = arith.constant 0 : i32
    %c0_i32_1 = arith.constant 0 : i32
    return %c0_i32, %c0_i32_0 : i32, i32
  }
  func.func @transform_9(%arg0: i32) -> (i32, i32) {
    %c0_i32 = arith.constant 0 : i32
    %c0_i32_0 = arith.constant 0 : i32
    %c0_i32_1 = arith.constant 0 : i32
    return %c0_i32, %c0_i32_0 : i32, i32
  }
  func.func @transform_10(%arg0: i32) -> (i32, i32) {
    %c0_i32 = arith.constant 0 : i32
    %c0_i32_0 = arith.constant 0 : i32
    %c0_i32_1 = arith.constant 0 : i32
    return %c0_i32, %c0_i32_0 : i32, i32
  }
  func.func @transform_11(%arg0: i32) -> (i32, i32) {
    %c0_i32 = arith.constant 0 : i32
    %c0_i32_0 = arith.constant 0 : i32
    %c0_i32_1 = arith.constant 0 : i32
    return %c0_i32, %c0_i32_0 : i32, i32
  }
  func.func @transform_12(%arg0: i32) -> (i32, i32) {
    %c0_i32 = arith.constant 0 : i32
    %c0_i32_0 = arith.constant 0 : i32
    %c0_i32_1 = arith.constant 0 : i32
    return %c0_i32, %c0_i32_0 : i32, i32
  }
  func.func @transform_13(%arg0: i32) -> (i32, i32) {
    %c0_i32 = arith.constant 0 : i32
    %c0_i32_0 = arith.constant 0 : i32
    %c0_i32_1 = arith.constant 0 : i32
    return %c0_i32, %c0_i32_0 : i32, i32
  }
  func.func @transform_14(%arg0: i32) -> (i32, i32) {
    %c0_i32 = arith.constant 0 : i32
    %c0_i32_0 = arith.constant 0 : i32
    %c0_i32_1 = arith.constant 0 : i32
    return %c0_i32, %c0_i32_0 : i32, i32
  }
  func.func @transform_15(%arg0: i32) -> (i32, i32) {
    %c0_i32 = arith.constant 0 : i32
    %c0_i32_0 = arith.constant 0 : i32
    %c0_i32_1 = arith.constant 0 : i32
    return %c0_i32, %c0_i32_0 : i32, i32
  }
  func.func @transform_16(%arg0: i32) -> (i32, i32) {
    %c0_i32 = arith.constant 0 : i32
    %c0_i32_0 = arith.constant 0 : i32
    %c0_i32_1 = arith.constant 0 : i32
    return %c0_i32, %c0_i32_0 : i32, i32
  }
  func.func @transform_17(%arg0: i32) -> (i32, i32) {
    %c0_i32 = arith.constant 0 : i32
    %c0_i32_0 = arith.constant 0 : i32
    %c0_i32_1 = arith.constant 0 : i32
    return %c0_i32, %c0_i32_0 : i32, i32
  }
  func.func @transform_18(%arg0: i32) -> (i32, i32) {
    %c0_i32 = arith.constant 0 : i32
    %c0_i32_0 = arith.constant 0 : i32
    %c0_i32_1 = arith.constant 0 : i32
    return %c0_i32, %c0_i32_0 : i32, i32
  }
  func.func @transform_19(%arg0: i32) -> (i32, i32) {
    %c0_i32 = arith.constant 0 : i32
    %c0_i32_0 = arith.constant 0 : i32
    return %arg0, %c0_i32 : i32, i32
  }
}

</mosaic_0001>

<bundles_post_ra>
// kernel: forward.1
= control target key start
LH: loop header
LB: loop body
LE: loop exit
PB: predicated region body
PF: predicated region fallthrough
CT: control target
= control target key end

     0   :  { %v2950_v0 = vmov 0   ;;  %vm143_vm0 = vcmask 818176   ;;  %vm407_vm1 = vcmask 523264   ;;  %vm640_vm2 = vcmask 392192   ;;  %s3747_s2 = inlined_call_operand.vmem [shape: f32[64,1], index: 2, kind: input, shape index: {}]   ;;  %s3748_s0 = inlined_call_operand.vmem [shape: f32[128,100], index: 0, kind: input, shape index: {}]   ;;  %s3749_s4 = inlined_call_operand.vmem [shape: f32[48,1], index: 4, kind: input, shape index: {}]   ;;  %s3750_s1 = inlined_call_operand.vmem [shape: bf16[128,100], index: 1, kind: input, shape index: {}]   ;;  %s3751_s6 = inlined_call_operand.vmem [shape: f32[64,1], index: 6, kind: input, shape index: {}]   ;;  %s3752_s8 = inlined_call_operand.vmem [shape: f32[48,1], index: 8, kind: input, shape index: {}]   ;;  %s3753_s10 = inlined_call_operand.vmem [shape: f32[64,1], index: 10, kind: input, shape index: {}]   ;;  %s3754_s12 = inlined_call_operand.vmem [shape: f32[64,1], index: 12, kind: input, shape index: {}]   ;;  %s3755_s14 = inlined_call_operand.vmem [shape: f32[120,1], index: 14, kind: input, shape index: {}]   ;;  %s3756_s16 = inlined_call_operand.vmem [shape: f32[184,1], index: 16, kind: input, shape index: {}]   ;;  %s3757_s18 = inlined_call_operand.vmem [shape: f32[128,1], index: 18, kind: input, shape index: {}]   ;;  %s3758_s3 = inlined_call_operand.vmem [shape: bf16[96,64], index: 3, kind: input, shape index: {}]   ;;  %s3759_s5 = inlined_call_operand.vmem [shape: bf16[64,48], index: 5, kind: input, shape index: {}]   ;;  %s3760_s7 = inlined_call_operand.vmem [shape: bf16[48,64], index: 7, kind: input, shape index: {}]   ;;  %s3761_s9 = inlined_call_operand.vmem [shape: bf16[64,48], index: 9, kind: input, shape index: {}]   ;;  %s3762_s11 = inlined_call_operand.vmem [shape: bf16[64,64], index: 11, kind: input, shape index: {}]   ;;  %s3763_s13 = inlined_call_operand.vmem [shape: bf16[120,64], index: 13, kind: input, shape index: {}]   ;;  %s3764_s15 = inlined_call_operand.vmem [shape: bf16[184,120], index: 15, kind: input, shape index: {}]   ;;  %s3765_s17 = inlined_call_operand.vmem [shape: bf16[128,184], index: 17, kind: input, shape index: {}]   ;;  %s3766_s19 = inlined_call_operand.vmem [shape: f32[128,100], index: 19, kind: output, shape index: {}]  }
   0x1   :  { %3771 = sst [smem:[#allocation2_spill]] %s3747_s2  ;;  %2680 = vset.pattern.permute.xlu1 %v2950_v0  ;;  %2679 = vset.pattern.permute.xlu0 %v2950_v0  ;;  %v573_v34 = vld [vmem:[%s3751_s6 + $0x8] sm:$0xff]  ;;  %v572_v36 = vld [vmem:[%s3751_s6] sm:$0xff]  ;;  %v575_v37 = vld [vmem:[%s3751_s6 + $0x18] sm:$0xff]  ;;  %vm2952_vm3 = vmmov 0   ;;  %vm1697_vm4 = vcmask 982016  }
   0x2   :  { %3772 = sst [smem:[#allocation3_spill]] %s3748_s0  ;;  %s3775_s20 = sld [smem:[#allocation2_spill]]  ;;  %v574_v38 = vld [vmem:[%s3751_s6 + $0x10] sm:$0xff]  ;;  %v577_v42 = vld [vmem:[%s3751_s6 + $0x28] sm:$0xff]  ;;  %v576_v44 = vld [vmem:[%s3751_s6 + $0x20] sm:$0xff]  ;;  %vm1734_vm5 = vcmask 1043456  }
   0x3   :  { %3773 = sst [smem:[#allocation4_spill]] %s3749_s4  ;;  %s3776_s23 = sld [smem:[#allocation3_spill]]  ;;  %v579_v45 = vld [vmem:[%s3751_s6 + $0x38] sm:$0xff]  ;;  %v578_v46 = vld [vmem:[%s3751_s6 + $0x30] sm:$0xff]  ;;  %v737_v50 = vld [vmem:[%s3752_s8 + $0x8] sm:$0xff]  ;;  %vm2085_vm6 = vcmask 457728  }
   0x4   :  { %3774 = sst [smem:[#allocation5_spill]] %s3750_s1  ;;  %s3777_s22 = sld [smem:[#allocation4_spill]]  ;;  %v736_v52 = vld [vmem:[%s3752_s8] sm:$0xff]  ;;  %v739_v53 = vld [vmem:[%s3752_s8 + $0x18] sm:$0xff]  ;;  %v738_v54 = vld [vmem:[%s3752_s8 + $0x10] sm:$0xff] }
   0x5   :  { %s3778_s29 = sld [smem:[#allocation5_spill]]  ;;  %v741_v58 = vld [vmem:[%s3752_s8 + $0x28] sm:$0xff]  ;;  %v740_v60 = vld [vmem:[%s3752_s8 + $0x20] sm:$0xff] }
   0x6   :  { %v871_v61 = vld [vmem:[%s3753_s10 + $0x8] sm:$0xff]  ;;  %v870_v62 = vld [vmem:[%s3753_s10] sm:$0xff] }
   0x8   :  { %v299_v1 = vld [vmem:[%s3775_s20 + $0x10] sm:$0xff]  ;;  %v297_v2 = vld [vmem:[%s3775_s20] sm:$0xff]  ;;  %v300_v6 = vld [vmem:[%s3775_s20 + $0x18] sm:$0xff] }
   0x9   :  { %v63_v3 = vld [vmem:[%s3776_s23] sm:$0xff]  ;;  %317 = vperm.xlu1 %2680, %v299_v1   ;;  %307 = vperm.xlu0 %2679, %v297_v2   ;;  %v64_v4 = vld [vmem:[%s3776_s23 + $0x8] sm:$0xff]  ;;  %v65_v7 = vld [vmem:[%s3776_s23 + $0x10] sm:$0xff] }
   0xa   :  { %v79_v5 = vpack.c.bf16 %v64_v4, %v63_v3  ;;  %v298_v8 = vld [vmem:[%s3775_s20 + $0x8] sm:$0xff]  ;;  %v66_v9 = vld [vmem:[%s3776_s23 + $0x18] sm:$0xff]  ;;  %v301_v13 = vld [vmem:[%s3775_s20 + $0x20] sm:$0xff] }
   0xb   :  { %v80_v11 = vpack.c.bf16 %v66_v9, %v65_v7  ;;  %v302_v12 = vld [vmem:[%s3775_s20 + $0x28] sm:$0xff]  ;;  %v67_v14 = vld [vmem:[%s3776_s23 + $0x20] sm:$0xff]  ;;  %v304_v17 = vld [vmem:[%s3775_s20 + $0x38] sm:$0xff] }
   0xc   :  { %2667 = vmatprep.subr.msk.bf16.mxu0 %vm143_vm0, %v79_v5  ;;  %v169_v10 = vsel %vm143_vm0, %v79_v5, 0  ;;  %v68_v15 = vld [vmem:[%s3776_s23 + $0x28] sm:$0xff]  ;;  %v303_v19 = vld [vmem:[%s3775_s20 + $0x30] sm:$0xff]  ;;  %v513_v21 = vld [vmem:[%s3777_s22] sm:$0xff] }
   0xd   :  { %2488 = vmatpush3.bf16.xpose.msra.mxu0 %v169_v10  ;;  %322 = vperm.xlu1 %2680, %v300_v6   ;;  %v172_v16 = vsel %vm143_vm0, %v80_v11, 0  ;;  %v81_v18 = vpack.c.bf16 %v68_v15, %v67_v14  ;;  %v514_v20 = vld [vmem:[%s3777_s22 + $0x8] sm:$0xff]  ;;  %v69_v22 = vld [vmem:[%s3776_s23 + $0x30] sm:$0xff]  ;;  %v70_v23 = vld [vmem:[%s3776_s23 + $0x38] sm:$0xff] }
   0xe   :  { %312 = vperm.xlu0 %2679, %v298_v8   ;;  %2668 = vmatprep.subr.msk.bf16.mxu0 %vm143_vm0, %v80_v11  ;;  %v2681_v24 = vld [vmem:[%s3778_s29] sm:$0xff]   ;;  %v516_v26 = vld [vmem:[%s3777_s22 + $0x18] sm:$0xff]  ;;  %v82_v27 = vpack.c.bf16 %v70_v23, %v69_v22  ;;  %v515_v28 = vld [vmem:[%s3777_s22 + $0x10] sm:$0xff] }
   0xf   :  { %v175_v25 = vsel %vm143_vm0, %v81_v18, 0  ;;  %2503 = vmatprep.mubr.msk.bf16.mxu0 %vm143_vm0, %v2681_v24  ;;  %v518_v29 = vld [vmem:[%s3777_s22 + $0x28] sm:$0xff]  ;;  %v517_v30 = vld [vmem:[%s3777_s22 + $0x20] sm:$0xff]  ;;  %v73_v39 = vld [vmem:[%s3776_s23 + $0x50] sm:$0xff] }
  0x10   :  { %v71_v31 = vld [vmem:[%s3776_s23 + $0x40] sm:$0xff]  ;;  %v72_v32 = vld [vmem:[%s3776_s23 + $0x48] sm:$0xff]  ;;  %v178_v33 = vsel %vm143_vm0, %v82_v27, 0  ;;  %v74_v40 = vld [vmem:[%s3776_s23 + $0x58] sm:$0xff] }
  0x11   :  { %332 = vperm.xlu1 %2680, %v302_v12   ;;  %v83_v35 = vpack.c.bf16 %v72_v32, %v71_v31  ;;  %v84_v43 = vpack.c.bf16 %v74_v40, %v73_v39  ;;  %v75_v47 = vld [vmem:[%s3776_s23 + $0x60] sm:$0xff]  ;;  %v76_v48 = vld [vmem:[%s3776_s23 + $0x68] sm:$0xff]  ;;  %v77_v55 = vld [vmem:[%s3776_s23 + $0x70] sm:$0xff] }
  0x12   :  { %327 = vperm.xlu0 %2679, %v301_v13   ;;  %v85_v51 = vpack.c.bf16 %v76_v48, %v75_v47  ;;  %v78_v56 = vld [vmem:[%s3776_s23 + $0x78] sm:$0xff]  ;;  %v872_v2 = vld [vmem:[%s3753_s10 + $0x10] sm:$0xff]  ;;  %v875_v3 = vld [vmem:[%s3753_s10 + $0x28] sm:$0xff] }
  0x13   :  { %v181_v41 = vsel %vm143_vm0, %v83_v35, 0  ;;  %v184_v49 = vsel %vm143_vm0, %v84_v43, 0  ;;  %v86_v59 = vpack.c.bf16 %v78_v56, %v77_v55  ;;  %v873_v1 = vld [vmem:[%s3753_s10 + $0x18] sm:$0xff]  ;;  %v874_v4 = vld [vmem:[%s3753_s10 + $0x20] sm:$0xff]  ;;  %v2682_v5 = vld [vmem:[%s3778_s29 + $0x8] sm:$0xff]  }
  0x14   :  { %v187_v57 = vsel %vm143_vm0, %v85_v51, 0  ;;  %v2683_v6 = vld [vmem:[%s3778_s29 + $0x10] sm:$0xff]   ;;  %v877_v7 = vld [vmem:[%s3753_s10 + $0x38] sm:$0xff]  ;;  %v1036_v9 = vld [vmem:[%s3754_s12 + $0x8] sm:$0xff] }
  0x15   :  { %2490 = vmatpush3.bf16.xpose.msra.mxu0 %v172_v16  ;;  %342 = vperm.xlu1 %2680, %v304_v17   ;;  %v190_v63 = vsel %vm143_vm0, %v86_v59, 0  ;;  %v876_v8 = vld [vmem:[%s3753_s10 + $0x30] sm:$0xff]  ;;  %v1035_v10 = vld [vmem:[%s3754_s12] sm:$0xff]  ;;  %v2684_v11 = vld [vmem:[%s3778_s29 + $0x18] sm:$0xff]  }
  0x16   :  { %337 = vperm.xlu0 %2679, %v303_v19   ;;  %2669 = vmatprep.subr.msk.bf16.mxu0 %vm143_vm0, %v81_v18  ;;  %v2685_v12 = vld [vmem:[%s3778_s29 + $0x20] sm:$0xff]   ;;  %v1038_v13 = vld [vmem:[%s3754_s12 + $0x18] sm:$0xff]  ;;  %v1037_v14 = vld [vmem:[%s3754_s12 + $0x10] sm:$0xff] }
  0x17   :  { %v1040_v15 = vld [vmem:[%s3754_s12 + $0x28] sm:$0xff]  ;;  %v1039_v16 = vld [vmem:[%s3754_s12 + $0x20] sm:$0xff]  ;;  %v2687_v18 = vld [vmem:[%s3778_s29 + $0x30] sm:$0xff]  }
  0x18   :  { %v2686_v17 = vld [vmem:[%s3778_s29 + $0x28] sm:$0xff]   ;;  %v1042_v19 = vld [vmem:[%s3754_s12 + $0x38] sm:$0xff]  ;;  %v1207_v22 = vld [vmem:[%s3755_s14] sm:$0xff] }
  0x19   :  { %526 = vperm.xlu1 %2680, %v514_v20   ;;  %v1041_v20 = vld [vmem:[%s3754_s12 + $0x30] sm:$0xff]  ;;  %v2688_v23 = vld [vmem:[%s3778_s29 + $0x38] sm:$0xff]   ;;  %v1215_v31 = vld [vmem:[%s3755_s14 + $0x40] sm:$0xff] }
  0x1a   :  { %521 = vperm.xlu0 %2679, %v513_v21   ;;  %v1208_v21 = vld [vmem:[%s3755_s14 + $0x8] sm:$0xff]  ;;  %v1210_v24 = vld [vmem:[%s3755_s14 + $0x18] sm:$0xff]  ;;  %v1505_v40 = vld [vmem:[%s3756_s16 + $0x20] sm:$0xff] }
  0x1b   :  { %v1218_v32 = vld [vmem:[%s3755_s14 + $0x58] sm:$0xff]  ;;  %v1502_v39 = vld [vmem:[%s3756_s16 + $0x8] sm:$0xff]  ;;  %v1513_v48 = vld [vmem:[%s3756_s16 + $0x60] sm:$0xff] }
  0x1c   :  { %v1510_v47 = vld [vmem:[%s3756_s16 + $0x48] sm:$0xff]  ;;  %v1521_v56 = vld [vmem:[%s3756_s16 + $0xa0] sm:$0xff] }
  0x1d   :  { %2492 = vmatpush3.bf16.xpose.msra.mxu0 %v175_v25  ;;  %536 = vperm.xlu1 %2680, %v516_v26   ;;  %v1209_v25 = vld [vmem:[%s3755_s14 + $0x10] sm:$0xff]  ;;  %v1212_v26 = vld [vmem:[%s3755_s14 + $0x28] sm:$0xff] }
  0x1e   :  { %531 = vperm.xlu0 %2679, %v515_v28   ;;  %2670 = vmatprep.subr.msk.bf16.mxu0 %vm143_vm0, %v82_v27  ;;  %v1211_v27 = vld [vmem:[%s3755_s14 + $0x20] sm:$0xff]  ;;  %v1214_v28 = vld [vmem:[%s3755_s14 + $0x38] sm:$0xff]  ;;  %v1518_v55 = vld [vmem:[%s3756_s16 + $0x88] sm:$0xff] }
  0x21   :  { %546 = vperm.xlu1 %2680, %v518_v29   ;;  %v1213_v29 = vld [vmem:[%s3755_s14 + $0x30] sm:$0xff] }
  0x22   :  { %541 = vperm.xlu0 %2679, %v517_v30   ;;  %v1216_v30 = vld [vmem:[%s3755_s14 + $0x48] sm:$0xff] }
  0x25   :  { %2494 = vmatpush3.bf16.xpose.msra.mxu0 %v178_v33  ;;  %587 = vperm.xlu1 %2680, %v573_v34   ;;  %v1217_v33 = vld [vmem:[%s3755_s14 + $0x50] sm:$0xff]  ;;  %v1220_v34 = vld [vmem:[%s3755_s14 + $0x68] sm:$0xff] }
  0x26   :  { %582 = vperm.xlu0 %2679, %v572_v36   ;;  %2671 = vmatprep.subr.msk.bf16.mxu0 %vm143_vm0, %v83_v35  ;;  %v1219_v35 = vld [vmem:[%s3755_s14 + $0x60] sm:$0xff] }
  0x27   :  { %v1501_v36 = vld [vmem:[%s3756_s16] sm:$0xff] }
  0x29   :  { %597 = vperm.xlu1 %2680, %v575_v37   ;;  %v1221_v37 = vld [vmem:[%s3755_s14 + $0x70] sm:$0xff] }
  0x2a   :  { %592 = vperm.xlu0 %2679, %v574_v38   ;;  %v1503_v38 = vld [vmem:[%s3756_s16 + $0x10] sm:$0xff] }
  0x2d   :  { %2496 = vmatpush3.bf16.xpose.msra.mxu0 %v181_v41  ;;  %607 = vperm.xlu1 %2680, %v577_v42   ;;  %v1504_v41 = vld [vmem:[%s3756_s16 + $0x18] sm:$0xff]  ;;  %v1507_v42 = vld [vmem:[%s3756_s16 + $0x30] sm:$0xff] }
  0x2e   :  { %602 = vperm.xlu0 %2679, %v576_v44   ;;  %2672 = vmatprep.subr.msk.bf16.mxu0 %vm143_vm0, %v84_v43  ;;  %v1506_v43 = vld [vmem:[%s3756_s16 + $0x28] sm:$0xff]  ;;  %v1509_v44 = vld [vmem:[%s3756_s16 + $0x40] sm:$0xff] }
  0x31   :  { %617 = vperm.xlu1 %2680, %v579_v45   ;;  %v1508_v45 = vld [vmem:[%s3756_s16 + $0x38] sm:$0xff] }
  0x32   :  { %612 = vperm.xlu0 %2679, %v578_v46   ;;  %v1511_v46 = vld [vmem:[%s3756_s16 + $0x50] sm:$0xff] }
  0x35   :  { %2498 = vmatpush3.bf16.xpose.msra.mxu0 %v184_v49  ;;  %749 = vperm.xlu1 %2680, %v737_v50   ;;  %v1512_v49 = vld [vmem:[%s3756_s16 + $0x58] sm:$0xff]  ;;  %v1515_v50 = vld [vmem:[%s3756_s16 + $0x70] sm:$0xff] }
  0x36   :  { %744 = vperm.xlu0 %2679, %v736_v52   ;;  %2673 = vmatprep.subr.msk.bf16.mxu0 %vm143_vm0, %v85_v51  ;;  %v1514_v51 = vld [vmem:[%s3756_s16 + $0x68] sm:$0xff]  ;;  %v1517_v52 = vld [vmem:[%s3756_s16 + $0x80] sm:$0xff] }
  0x39   :  { %759 = vperm.xlu1 %2680, %v739_v53   ;;  %v1516_v53 = vld [vmem:[%s3756_s16 + $0x78] sm:$0xff] }
  0x3a   :  { %754 = vperm.xlu0 %2679, %v738_v54   ;;  %v1519_v54 = vld [vmem:[%s3756_s16 + $0x90] sm:$0xff] }
  0x3d   :  { %2500 = vmatpush3.bf16.xpose.msra.mxu0 %v187_v57  ;;  %769 = vperm.xlu1 %2680, %v741_v58   ;;  %v1520_v57 = vld [vmem:[%s3756_s16 + $0x98] sm:$0xff]  ;;  %v1523_v58 = vld [vmem:[%s3756_s16 + $0xb0] sm:$0xff] }
  0x3e   :  { %764 = vperm.xlu0 %2679, %v740_v60   ;;  %2674 = vmatprep.subr.msk.bf16.mxu0 %vm143_vm0, %v86_v59  ;;  %v1522_v59 = vld [vmem:[%s3756_s16 + $0xa8] sm:$0xff] }
  0x3f   :  { %v1918_v60 = vld [vmem:[%s3757_s18 + $0x8] sm:$0xff] }
  0x41   :  { %885 = vperm.xlu1 %2680, %v871_v61   ;;  %v1917_v61 = vld [vmem:[%s3757_s18] sm:$0xff] }
  0x42   :  { %880 = vperm.xlu0 %2679, %v870_v62   ;;  %v1920_v62 = vld [vmem:[%s3757_s18 + $0x18] sm:$0xff] }
  0x45   :  { %2502 = vmatpush3.bf16.xpose.msra.mxu0 %v190_v63  ;;  %895 = vperm.xlu1 %2680, %v873_v1   ;;  %v1919_v63 = vld [vmem:[%s3757_s18 + $0x10] sm:$0xff]  ;;  %v1922_v1 = vld [vmem:[%s3757_s18 + $0x28] sm:$0xff] }
  0x46   :  { %890 = vperm.xlu0 %2679, %v872_v2   ;;  %v1921_v2 = vld [vmem:[%s3757_s18 + $0x20] sm:$0xff] }
  0x49   :  { %905 = vperm.xlu1 %2680, %v875_v3   ;;  %v1924_v3 = vld [vmem:[%s3757_s18 + $0x38] sm:$0xff] }
  0x4a   :  { %900 = vperm.xlu0 %2679, %v874_v4   ;;  %v1923_v4 = vld [vmem:[%s3757_s18 + $0x30] sm:$0xff] }
  0x4c   :  { %2504 = vmatmul.mubr.msk.bf16.vlgmr.msra.gmra.mrb[0].mxu0 %vm143_vm0, %v2682_v5  ;;  %v1926_v5 = vld [vmem:[%s3757_s18 + $0x48] sm:$0xff] }
  0x4d   :  { %915 = vperm.xlu1 %2680, %v877_v7   ;;  %2507 = vmatprep.mubr.msk.bf16.mxu0 %vm143_vm0, %v2683_v6  ;;  %v1925_v6 = vld [vmem:[%s3757_s18 + $0x40] sm:$0xff]  ;;  %v1928_v7 = vld [vmem:[%s3757_s18 + $0x58] sm:$0xff] }
  0x4e   :  { %910 = vperm.xlu0 %2679, %v876_v8   ;;  %v1927_v8 = vld [vmem:[%s3757_s18 + $0x50] sm:$0xff] }
  0x51   :  { %1050 = vperm.xlu1 %2680, %v1036_v9   ;;  %v1930_v9 = vld [vmem:[%s3757_s18 + $0x68] sm:$0xff] }
  0x52   :  { %1045 = vperm.xlu0 %2679, %v1035_v10   ;;  %v1929_v10 = vld [vmem:[%s3757_s18 + $0x60] sm:$0xff] }
  0x54   :  { %2508 = vmatmul.mubr.msk.bf16.gmra.mrb[4].mxu0 %vm143_vm0, %v2684_v11  ;;  %v1932_v11 = vld [vmem:[%s3757_s18 + $0x78] sm:$0xff] }
  0x55   :  { %1060 = vperm.xlu1 %2680, %v1038_v13   ;;  %2511 = vmatprep.mubr.msk.bf16.mxu0 %vm143_vm0, %v2685_v12  ;;  %v1931_v12 = vld [vmem:[%s3757_s18 + $0x70] sm:$0xff]  ;;  %v2689_v13 = vld [vmem:[%s3758_s3] sm:$0xff]  }
  0x56   :  { %1055 = vperm.xlu0 %2679, %v1037_v14   ;;  %2527 = vmatprep.mubr.msk.bf16.mxu1 %vm407_vm1, %v2689_v13 }
  0x59   :  { %1070 = vperm.xlu1 %2680, %v1040_v15  }
  0x5a   :  { %1065 = vperm.xlu0 %2679, %v1039_v16  }
  0x5c   :  { %2512 = vmatmul.mubr.msk.bf16.gmra.mrb[8].mxu0 %vm143_vm0, %v2686_v17 }
  0x5d   :  { %1080 = vperm.xlu1 %2680, %v1042_v19   ;;  %2515 = vmatprep.mubr.msk.bf16.mxu0 %vm143_vm0, %v2687_v18 }
  0x5e   :  { %1075 = vperm.xlu0 %2679, %v1041_v20  }
  0x61   :  { %1229 = vperm.xlu1 %2680, %v1208_v21  }
  0x62   :  { %1224 = vperm.xlu0 %2679, %v1207_v22  }
  0x64   :  { %2516 = vmatmul.mubr.msk.bf16.gmra.mrb[12].mxu0 %vm143_vm0, %v2688_v23 }
  0x65   :  { %1239 = vperm.xlu1 %2680, %v1210_v24  }
  0x66   :  { %1234 = vperm.xlu0 %2679, %v1209_v25  }
  0x69   :  { %1249 = vperm.xlu1 %2680, %v1212_v26  }
  0x6a   :  { %1244 = vperm.xlu0 %2679, %v1211_v27  }
  0x6d   :  { %1259 = vperm.xlu1 %2680, %v1214_v28  }
  0x6e   :  { %1254 = vperm.xlu0 %2679, %v1213_v29  }
  0x71   :  { %1269 = vperm.xlu1 %2680, %v1216_v30  }
  0x72   :  { %1264 = vperm.xlu0 %2679, %v1215_v31  }
  0x75   :  { %1279 = vperm.xlu1 %2680, %v1218_v32  }
  0x76   :  { %1274 = vperm.xlu0 %2679, %v1217_v33  }
  0x79   :  { %1289 = vperm.xlu1 %2680, %v1220_v34  }
  0x7a   :  { %1284 = vperm.xlu0 %2679, %v1219_v35  }
  0x7d   :  { %1526 = vperm.xlu1 %2680, %v1501_v36  }
  0x7e   :  { %1294 = vperm.xlu0 %2679, %v1221_v37  }
  0x81   :  { %1536 = vperm.xlu1 %2680, %v1503_v38  }
  0x82   :  { %1531 = vperm.xlu0 %2679, %v1502_v39  }
  0x85   :  { %1546 = vperm.xlu1 %2680, %v1505_v40  }
  0x86   :  { %1541 = vperm.xlu0 %2679, %v1504_v41  }
  0x88   :  { %v308_v18 = vpop.permute.xlu0 %307  ;;  %v318_v21 = vpop.permute.xlu1 %317 }
  0x89   :  { %1556 = vperm.xlu1 %2680, %v1507_v42  }
  0x8a   :  { %1551 = vperm.xlu0 %2679, %v1506_v43  }
  0x8c   :  { %v323_v25 = vpop.permute.xlu1 %322 }
  0x8d   :  { %1566 = vperm.xlu1 %2680, %v1509_v44   ;;  %v313_v24 = vpop.permute.xlu0 %312 }
  0x8e   :  { %1561 = vperm.xlu0 %2679, %v1508_v45  }
  0x90   :  { %v333_v38 = vpop.permute.xlu1 %332 }
  0x91   :  { %1576 = vperm.xlu1 %2680, %v1511_v46   ;;  %v328_v34 = vpop.permute.xlu0 %327 }
  0x92   :  { %1571 = vperm.xlu0 %2679, %v1510_v47  }
  0x95   :  { %1586 = vperm.xlu1 %2680, %v1513_v48   ;;  %v338_v43 = vpop.permute.xlu0 %337 }
  0x96   :  { %1581 = vperm.xlu0 %2679, %v1512_v49   ;;  %v343_v49 = vpop.permute.xlu1 %342 }
  0x99   :  { %1596 = vperm.xlu1 %2680, %v1515_v50   ;;  %v522_v13 = vpop.permute.xlu0 %521 }
  0x9a   :  { %1591 = vperm.xlu0 %2679, %v1514_v51  }
  0x9d   :  { %1606 = vperm.xlu1 %2680, %v1517_v52  }
  0x9e   :  { %1601 = vperm.xlu0 %2679, %v1516_v53  }
  0xa1   :  { %1616 = vperm.xlu1 %2680, %v1519_v54  }
  0xa2   :  { %1611 = vperm.xlu0 %2679, %v1518_v55  }
  0xa5   :  { %1626 = vperm.xlu1 %2680, %v1521_v56  }
  0xa6   :  { %1621 = vperm.xlu0 %2679, %v1520_v57  }
  0xa9   :  { %1636 = vperm.xlu1 %2680, %v1523_v58  }
  0xaa   :  { %1631 = vperm.xlu0 %2679, %v1522_v59  }
  0xad   :  { %1940 = vperm.xlu1 %2680, %v1918_v60  }
  0xae   :  { %1935 = vperm.xlu0 %2679, %v1917_v61  }
  0xb1   :  { %1950 = vperm.xlu1 %2680, %v1920_v62  }
  0xb2   :  { %1945 = vperm.xlu0 %2679, %v1919_v63  }
  0xb5   :  { %1960 = vperm.xlu1 %2680, %v1922_v1  }
  0xb6   :  { %1955 = vperm.xlu0 %2679, %v1921_v2  }
  0xb9   :  { %1970 = vperm.xlu1 %2680, %v1924_v3   ;;  %v2690_v3 = vld [vmem:[%s3758_s3 + $0x8] sm:$0xff]  }
  0xba   :  { %1965 = vperm.xlu0 %2679, %v1923_v4   ;;  %v2691_v4 = vld [vmem:[%s3758_s3 + $0x10] sm:$0xff]  }
  0xbd   :  { %1980 = vperm.xlu1 %2680, %v1926_v5   ;;  %v2692_v5 = vld [vmem:[%s3758_s3 + $0x18] sm:$0xff]  }
  0xbe   :  { %1975 = vperm.xlu0 %2679, %v1925_v6   ;;  %v2693_v6 = vld [vmem:[%s3758_s3 + $0x20] sm:$0xff]  }
  0xc1   :  { %1990 = vperm.xlu1 %2680, %v1928_v7   ;;  %v2694_v7 = vld [vmem:[%s3758_s3 + $0x28] sm:$0xff]  }
  0xc2   :  { %1985 = vperm.xlu0 %2679, %v1927_v8   ;;  %v2695_v8 = vld [vmem:[%s3759_s5] sm:$0xff]  }
  0xc3   :  { %2545 = vmatprep.mubr.msk.bf16.mxu0 %vm640_vm2, %v2695_v8 }
  0xc5   :  { %2000 = vperm.xlu1 %2680, %v1930_v9  }
  0xc6   :  { %1995 = vperm.xlu0 %2679, %v1929_v10  }
  0xc9   :  { %2010 = vperm.xlu1 %2680, %v1932_v11  }
  0xca   :  { %2005 = vperm.xlu0 %2679, %v1931_v12  }
 0x11f   :  { %v2505_v14 = vpop.f32.mrb[0].mxu0 }
 0x120   :  { %v226_v15 = vpop.f32.mrb[1].mxu0 }
 0x121   :  { %v2506_v16 = vpop.f32.mrb[2].mxu0 }
 0x122   :  { %v229_v17 = vpop.f32.mrb[3].mxu0 }
 0x127   :  { %v2509_v19 = vpop.f32.mrb[4].mxu0 }
 0x128   :  { %v242_v20 = vpop.f32.mrb[5].mxu0 }
 0x129   :  { %v2510_v22 = vpop.f32.mrb[6].mxu0 }
 0x12a   :  { %v245_v23 = vpop.f32.mrb[7].mxu0 }
 0x12f   :  { %v2513_v26 = vpop.f32.mrb[8].mxu0 }
 0x130   :  { %v291_v27 = vmax.f32 %v2505_v14, %v2513_v26  ;;  %v258_v28 = vpop.f32.mrb[9].mxu0  ;;  %v527_v14 = vpop.permute.xlu1 %526 }
 0x131   :  { %v289_v29 = vmax.f32 %v226_v15, %v258_v28  ;;  %v2514_v30 = vpop.f32.mrb[10].mxu0 }
 0x132   :  { %v347_v31 = vadd.f32 %v318_v21, %v291_v27  ;;  %v292_v32 = vmax.f32 %v2506_v16, %v2514_v30  ;;  %v261_v33 = vpop.f32.mrb[11].mxu0 }
 0x133   :  { %v345_v35 = vadd.f32 %v308_v18, %v289_v29  ;;  %v290_v36 = vmax.f32 %v229_v17, %v261_v33 }
 0x134   :  { %2754 = vtanh.f32 %v347_v31  ;;  %v348_v37 = vadd.f32 %v323_v25, %v292_v32 }
 0x135   :  { %2756 = vtanh.f32 %v345_v35  ;;  %v346_v39 = vadd.f32 %v313_v24, %v290_v36  ;;  %v537_v24 = vpop.permute.xlu1 %536 }
 0x136   :  { %2758 = vtanh.f32 %v348_v37 }
 0x137   :  { %2760 = vtanh.f32 %v346_v39  ;;  %v2517_v40 = vpop.f32.mrb[12].mxu0 }
 0x138   :  { %v295_v41 = vmax.f32 %v2509_v19, %v2517_v40  ;;  %v274_v42 = vpop.f32.mrb[13].mxu0 }
 0x139   :  { %v293_v44 = vmax.f32 %v242_v20, %v274_v42  ;;  %v2518_v45 = vpop.f32.mrb[14].mxu0 }
 0x13a   :  { %v351_v46 = vadd.f32 %v338_v43, %v295_v41  ;;  %v296_v47 = vmax.f32 %v2510_v22, %v2518_v45  ;;  %v277_v48 = vpop.f32.mrb[15].mxu0  ;;  %v532_v22 = vpop.permute.xlu0 %531 }
 0x13b   :  { %v349_v50 = vadd.f32 %v328_v34, %v293_v44  ;;  %v294_v51 = vmax.f32 %v245_v23, %v277_v48  ;;  %v547_v34 = vpop.permute.xlu1 %546  ;;  %v2696_v48 = vld [vmem:[%s3759_s5 + $0x8] sm:$0xff]  }
 0x13c   :  { %2762 = vtanh.f32 %v351_v46  ;;  %v352_v52 = vadd.f32 %v343_v49, %v296_v47  ;;  %v2697_v49 = vld [vmem:[%s3759_s5 + $0x10] sm:$0xff]  }
 0x13d   :  { %2764 = vtanh.f32 %v349_v50  ;;  %v350_v53 = vadd.f32 %v333_v38, %v294_v51  ;;  %v2698_v50 = vld [vmem:[%s3759_s5 + $0x18] sm:$0xff]   ;;  %v2951_v51 = vmov 0.0  }
 0x13e   :  { %v2755_v54 = vpop.eup %2754  ;;  %2766 = vtanh.f32 %v352_v52  ;;  %v542_v28 = vpop.permute.xlu0 %541 }
 0x13f   :  { %v2757_v55 = vpop.eup %2756  ;;  %2768 = vtanh.f32 %v350_v53  ;;  %v588_v53 = vpop.permute.xlu1 %587 }
 0x140   :  { %v2759_v56 = vpop.eup %2758 }
 0x141   :  { %v2761_v57 = vpop.eup %2760  ;;  %v374_v58 = vpack.c.bf16 %v2759_v56, %v2755_v54 }
 0x142   :  { %v373_v59 = vpack.c.bf16 %v2761_v57, %v2757_v55  ;;  %v583_v52 = vpop.permute.xlu0 %582 }
 0x143   :  { %v598_v55 = vpop.permute.xlu1 %597 }
 0x144   :  { %2519 = vmatprep.subr.bf16.mxu1 %v373_v59 }
 0x145   :  { %2520 = vmatpush3.bf16.msra.mxu1 %v373_v59 }
 0x146   :  { %v2763_v60 = vpop.eup %2762  ;;  %2521 = vmatprep.subr.bf16.mxu1 %v374_v58  ;;  %v593_v54 = vpop.permute.xlu0 %592 }
 0x147   :  { %v2765_v61 = vpop.eup %2764 }
 0x148   :  { %v2767_v62 = vpop.eup %2766 }
 0x149   :  { %v2769_v63 = vpop.eup %2768  ;;  %2522 = vmatpush3.bf16.msra.mxu1 %v374_v58  ;;  %v376_v1 = vpack.c.bf16 %v2767_v62, %v2763_v60 }
 0x14a   :  { %v375_v2 = vpack.c.bf16 %v2769_v63, %v2765_v61  ;;  %v603_v59 = vpop.permute.xlu0 %602 }
 0x14c   :  { %2523 = vmatprep.subr.bf16.mxu1 %v375_v2 }
 0x14d   :  { %2524 = vmatpush3.bf16.msra.mxu1 %v375_v2 }
 0x14e   :  { %2525 = vmatprep.subr.bf16.mxu1 %v376_v1 }
 0x151   :  { %2526 = vmatpush3.bf16.msra.mxu1 %v376_v1  ;;  %v608_v1 = vpop.permute.xlu1 %607 }
 0x152   :  { %2553 = vmatprep.subr.bf16.mxu1 %v2951_v51 }
 0x154   :  { %2528 = vmatmul.mubr.msk.bf16.vlgmr.msra.gmra.mrb[0].mxu1 %vm407_vm1, %v2690_v3  ;;  %v613_v3 = vpop.permute.xlu0 %612 }
 0x155   :  { %2531 = vmatprep.mubr.msk.bf16.mxu1 %vm407_vm1, %v2691_v4 }
 0x15c   :  { %2532 = vmatmul.mubr.msk.bf16.gmra.mrb[4].mxu1 %vm407_vm1, %v2692_v5 }
 0x15d   :  { %2535 = vmatprep.mubr.msk.bf16.mxu1 %vm407_vm1, %v2693_v6 }
 0x164   :  { %2536 = vmatmul.mubr.msk.bf16.gmra.mrb[8].mxu1 %vm407_vm1, %v2694_v7  ;;  %v618_v7 = vpop.permute.xlu1 %617 }
 0x165   :  { %2561 = vmatprep.mubr.msk.bf16.mxu1 %vm2952_vm3, %v2951_v51 }
 0x227   :  { %v2529_v9 = vpop.f32.mrb[0].mxu1 }
 0x228   :  { %v460_v10 = vpop.f32.mrb[1].mxu1 }
 0x229   :  { %v2530_v11 = vpop.f32.mrb[2].mxu1 }
 0x22a   :  { %v463_v12 = vpop.f32.mrb[3].mxu1 }
 0x22f   :  { %v2533_v15 = vpop.f32.mrb[4].mxu1 }
 0x230   :  { %v507_v16 = vmax.f32 %v460_v10, %v2533_v15  ;;  %v476_v17 = vpop.f32.mrb[5].mxu1 }
 0x231   :  { %v2534_v18 = vpop.f32.mrb[6].mxu1 }
 0x232   :  { %v549_v19 = vadd.f32 %v522_v13, %v507_v16  ;;  %v508_v20 = vmax.f32 %v463_v12, %v2534_v18  ;;  %v479_v21 = vpop.f32.mrb[7].mxu1 }
 0x234   :  { %v550_v23 = vadd.f32 %v527_v14, %v508_v20  ;;  %2770 = vtanh.f32 %v549_v19 }
 0x236   :  { %2772 = vtanh.f32 %v550_v23 }
 0x237   :  { %v2537_v25 = vpop.f32.mrb[8].mxu1 }
 0x238   :  { %v511_v26 = vmax.f32 %v476_v17, %v2537_v25  ;;  %v492_v27 = vpop.f32.mrb[9].mxu1  ;;  %v2699_v25 = vld [vmem:[%s3760_s7] sm:$0xff]  }
 0x239   :  { %v509_v29 = vmax.f32 %v2529_v9, %v492_v27  ;;  %v2538_v30 = vpop.f32.mrb[10].mxu1  ;;  %v2701_v27 = vld [vmem:[%s3760_s7 + $0x10] sm:$0xff]  }
 0x23a   :  { %v553_v31 = vadd.f32 %v542_v28, %v511_v26  ;;  %v512_v32 = vmax.f32 %v479_v21, %v2538_v30  ;;  %v495_v33 = vpop.f32.mrb[11].mxu1  ;;  %v2700_v26 = vld [vmem:[%s3760_s7 + $0x8] sm:$0xff]   ;;  %v2702_v28 = vld [vmem:[%s3761_s9] sm:$0xff]  }
 0x23b   :  { %v551_v35 = vadd.f32 %v532_v22, %v509_v29  ;;  %v510_v36 = vmax.f32 %v2530_v11, %v495_v33  ;;  %v745_v29 = vpop.permute.xlu0 %744  ;;  %v750_v33 = vpop.permute.xlu1 %749 }
 0x23c   :  { %2774 = vtanh.f32 %v553_v31  ;;  %v554_v37 = vadd.f32 %v547_v34, %v512_v32 }
 0x23d   :  { %2776 = vtanh.f32 %v551_v35  ;;  %v552_v38 = vadd.f32 %v537_v24, %v510_v36 }
 0x23e   :  { %2778 = vtanh.f32 %v554_v37  ;;  %v2771_v39 = vpop.eup %2770 }
 0x23f   :  { %2780 = vtanh.f32 %v552_v38  ;;  %v755_v37 = vpop.permute.xlu0 %754 }
 0x240   :  { %v2773_v40 = vpop.eup %2772 }
 0x241   :  { %v569_v41 = vpack.c.bf16 %v2773_v40, %v2771_v39 }
 0x243   :  { %2539 = vmatprep.subr.bf16.mxu0 %v569_v41 }
 0x244   :  { %2540 = vmatpush3.bf16.msra.mxu0 %v569_v41  ;;  %v760_v41 = vpop.permute.xlu1 %759 }
 0x246   :  { %v2775_v42 = vpop.eup %2774 }
 0x247   :  { %v2777_v43 = vpop.eup %2776 }
 0x248   :  { %v2779_v44 = vpop.eup %2778 }
 0x249   :  { %v2781_v45 = vpop.eup %2780  ;;  %v571_v46 = vpack.c.bf16 %v2779_v44, %v2775_v42 }
 0x24a   :  { %v570_v47 = vpack.c.bf16 %v2781_v45, %v2777_v43 }
 0x24c   :  { %2541 = vmatprep.subr.bf16.mxu0 %v570_v47 }
 0x24d   :  { %2542 = vmatpush3.bf16.msra.mxu0 %v570_v47  ;;  %v765_v47 = vpop.permute.xlu0 %764 }
 0x24e   :  { %2543 = vmatprep.subr.bf16.mxu0 %v571_v46 }
 0x251   :  { %2544 = vmatpush3.bf16.msra.mxu0 %v571_v46 }
 0x254   :  { %2546 = vmatmul.mubr.msk.bf16.vlgmr.msra.gmra.mrb[16].mxu0 %vm640_vm2, %v2696_v48 }
 0x255   :  { %2549 = vmatprep.mubr.msk.bf16.mxu0 %vm640_vm2, %v2697_v49 }
 0x25c   :  { %2550 = vmatmul.mubr.msk.bf16.gmra.mrb[20].mxu0 %vm640_vm2, %v2698_v50 }
 0x327   :  { %v2547_v56 = vpop.f32.mrb[16].mxu0 }
 0x328   :  { %v696_v57 = vadd.f32 %v2547_v56, %v593_v54  ;;  %v687_v58 = vpop.f32.mrb[17].mxu0 }
 0x329   :  { %v688_v60 = vadd.f32 %v687_v58, %v583_v52  ;;  %v2548_v61 = vpop.f32.mrb[18].mxu0  ;;  %v770_v52 = vpop.permute.xlu1 %769 }
 0x32a   :  { %2782 = vtanh.f32 %v696_v57  ;;  %v699_v62 = vadd.f32 %v2548_v61, %v598_v55  ;;  %v690_v63 = vpop.f32.mrb[19].mxu0 }
 0x32b   :  { %2784 = vtanh.f32 %v688_v60  ;;  %v691_v2 = vadd.f32 %v690_v63, %v588_v53  ;;  %v2704_v63 = vld [vmem:[%s3761_s9 + $0x10] sm:$0xff]  }
 0x32c   :  { %2786 = vtanh.f32 %v699_v62  ;;  %v2703_v62 = vld [vmem:[%s3761_s9 + $0x8] sm:$0xff]  }
 0x32d   :  { %2788 = vtanh.f32 %v691_v2  ;;  %v2706_v2 = vld [vmem:[%s3762_s11] sm:$0xff]  }
 0x32e   :  { %2595 = vmatprep.mubr.msk.bf16.mxu0 %vm407_vm1, %v2706_v2 }
 0x32f   :  { %v2551_v4 = vpop.f32.mrb[20].mxu0 }
 0x330   :  { %v712_v5 = vadd.f32 %v2551_v4, %v613_v3  ;;  %v703_v6 = vpop.f32.mrb[21].mxu0  ;;  %v881_v3 = vpop.permute.xlu0 %880 }
 0x331   :  { %v704_v8 = vadd.f32 %v703_v6, %v603_v59  ;;  %v2552_v9 = vpop.f32.mrb[22].mxu0  ;;  %v886_v4 = vpop.permute.xlu1 %885 }
 0x332   :  { %2790 = vtanh.f32 %v712_v5  ;;  %v715_v10 = vadd.f32 %v2552_v9, %v618_v7  ;;  %v706_v11 = vpop.f32.mrb[23].mxu0 }
 0x333   :  { %2792 = vtanh.f32 %v704_v8  ;;  %v707_v12 = vadd.f32 %v706_v11, %v608_v1  ;;  %v2705_v1 = vld [vmem:[%s3761_s9 + $0x18] sm:$0xff]  }
 0x334   :  { %v2783_v13 = vpop.eup %2782  ;;  %2794 = vtanh.f32 %v715_v10  ;;  %v891_v5 = vpop.permute.xlu0 %890 }
 0x335   :  { %v2785_v14 = vpop.eup %2784  ;;  %2796 = vtanh.f32 %v707_v12  ;;  %v896_v6 = vpop.permute.xlu1 %895 }
 0x336   :  { %v2787_v15 = vpop.eup %2786 }
 0x337   :  { %v2789_v16 = vpop.eup %2788  ;;  %v733_v17 = vpack.c.bf16 %v2787_v15, %v2783_v13 }
 0x338   :  { %v732_v18 = vpack.c.bf16 %v2789_v16, %v2785_v14  ;;  %v901_v10 = vpop.permute.xlu0 %900 }
 0x339   :  { %v906_v15 = vpop.permute.xlu1 %905 }
 0x33a   :  { %2554 = vmatpush3.bf16.msra.mxu1 %v732_v18 }
 0x33b   :  { %2555 = vmatprep.subr.bf16.mxu1 %v2951_v51 }
 0x33c   :  { %v2791_v19 = vpop.eup %2790 }
 0x33d   :  { %v2793_v20 = vpop.eup %2792 }
 0x33e   :  { %v2795_v21 = vpop.eup %2794  ;;  %2556 = vmatpush3.bf16.msra.mxu1 %v733_v17  ;;  %v911_v17 = vpop.permute.xlu0 %910 }
 0x33f   :  { %v2797_v22 = vpop.eup %2796  ;;  %2557 = vmatprep.subr.bf16.mxu1 %v2951_v51  ;;  %v735_v23 = vpack.c.bf16 %v2795_v21, %v2791_v19  ;;  %v916_v21 = vpop.permute.xlu1 %915 }
 0x340   :  { %v734_v24 = vpack.c.bf16 %v2797_v22, %v2793_v20 }
 0x342   :  { %2558 = vmatpush3.bf16.msra.mxu1 %v734_v24 }
 0x343   :  { %2559 = vmatprep.subr.bf16.mxu1 %v2951_v51 }
 0x346   :  { %2560 = vmatpush3.bf16.msra.mxu1 %v735_v23 }
 0x349   :  { %2562 = vmatmul.mubr.msk.bf16.vlgmr.msra.gmra.mrb[12].mxu1 %vm407_vm1, %v2699_v25 }
 0x34a   :  { %2565 = vmatprep.mubr.msk.bf16.mxu1 %vm2952_vm3, %v2951_v51 }
 0x351   :  { %2566 = vmatmul.mubr.msk.bf16.gmra.mrb[16].mxu1 %vm407_vm1, %v2700_v26 }
 0x352   :  { %2569 = vmatprep.mubr.msk.bf16.mxu1 %vm2952_vm3, %v2951_v51 }
 0x359   :  { %2570 = vmatmul.mubr.msk.bf16.gmra.mrb[20].mxu1 %vm407_vm1, %v2701_v27 }
 0x35a   :  { %2579 = vmatprep.mubr.msk.bf16.mxu1 %vm640_vm2, %v2702_v28 }
 0x41c   :  { %v830_v30 = vpop.f32.mrb[12].mxu1 }
 0x41d   :  { %v831_v31 = vadd.f32 %v830_v30, %v745_v29  ;;  %v2563_v32 = vpop.f32.mrb[13].mxu1 }
 0x41e   :  { %v833_v34 = vpop.f32.mrb[14].mxu1 }
 0x41f   :  { %v834_v35 = vadd.f32 %v833_v34, %v750_v33  ;;  %v2564_v36 = vpop.f32.mrb[15].mxu1  ;;  %2798 = vtanh.f32 %v831_v31 }
 0x421   :  { %2800 = vtanh.f32 %v834_v35 }
 0x424   :  { %v838_v38 = vpop.f32.mrb[16].mxu1 }
 0x425   :  { %v839_v39 = vadd.f32 %v838_v38, %v755_v37  ;;  %v2567_v40 = vpop.f32.mrb[17].mxu1 }
 0x426   :  { %v841_v42 = vpop.f32.mrb[18].mxu1  ;;  %v2708_v40 = vld [vmem:[%s3762_s11 + $0x10] sm:$0xff]  }
 0x427   :  { %v842_v43 = vadd.f32 %v841_v42, %v760_v41  ;;  %v2568_v44 = vpop.f32.mrb[19].mxu1  ;;  %2802 = vtanh.f32 %v839_v39  ;;  %v2707_v39 = vld [vmem:[%s3762_s11 + $0x8] sm:$0xff]   ;;  %v2709_v41 = vld [vmem:[%s3762_s11 + $0x18] sm:$0xff]   ;;  %v2710_v42 = vld [vmem:[%s3763_s13] sm:$0xff]  }
 0x428   :  { %v1051_v44 = vpop.permute.xlu1 %1050 }
 0x429   :  { %2804 = vtanh.f32 %v842_v43  ;;  %v2799_v45 = vpop.eup %2798  ;;  %v1046_v43 = vpop.permute.xlu0 %1045 }
 0x42b   :  { %v2801_v46 = vpop.eup %2800 }
 0x42c   :  { %v846_v48 = vpop.f32.mrb[20].mxu1  ;;  %v867_v49 = vpack.c.bf16 %v2801_v46, %v2799_v45  ;;  %v1061_v46 = vpop.permute.xlu1 %1060 }
 0x42d   :  { %v847_v50 = vadd.f32 %v846_v48, %v765_v47  ;;  %v2571_v51 = vpop.f32.mrb[21].mxu1  ;;  %v1056_v45 = vpop.permute.xlu0 %1055 }
 0x42e   :  { %v849_v53 = vpop.f32.mrb[22].mxu1  ;;  %2573 = vmatprep.subr.bf16.mxu1 %v867_v49 }
 0x42f   :  { %v850_v54 = vadd.f32 %v849_v53, %v770_v52  ;;  %2574 = vmatpush3.bf16.msra.mxu1 %v867_v49  ;;  %v2572_v55 = vpop.f32.mrb[23].mxu1  ;;  %2806 = vtanh.f32 %v847_v50 }
 0x430   :  { %v1071_v55 = vpop.permute.xlu1 %1070 }
 0x431   :  { %2808 = vtanh.f32 %v850_v54  ;;  %v2803_v56 = vpop.eup %2802  ;;  %v1066_v50 = vpop.permute.xlu0 %1065 }
 0x433   :  { %v2805_v57 = vpop.eup %2804 }
 0x434   :  { %v868_v58 = vpack.c.bf16 %v2805_v57, %v2803_v56 }
 0x435   :  { %v1076_v57 = vpop.permute.xlu0 %1075 }
 0x436   :  { %2575 = vmatprep.subr.bf16.mxu1 %v868_v58 }
 0x437   :  { %2576 = vmatpush3.bf16.msra.mxu1 %v868_v58 }
 0x439   :  { %v2807_v59 = vpop.eup %2806 }
 0x43b   :  { %v2809_v60 = vpop.eup %2808 }
 0x43c   :  { %v869_v61 = vpack.c.bf16 %v2809_v60, %v2807_v59 }
 0x43e   :  { %2577 = vmatprep.subr.bf16.mxu1 %v869_v61 }
 0x43f   :  { %2578 = vmatpush3.bf16.msra.mxu1 %v869_v61  ;;  %v1081_v61 = vpop.permute.xlu1 %1080 }
 0x442   :  { %2580 = vmatmul.mubr.msk.bf16.vlgmr.msra.gmra.mrb[24].mxu1 %vm640_vm2, %v2703_v62 }
 0x443   :  { %2583 = vmatprep.mubr.msk.bf16.mxu1 %vm640_vm2, %v2704_v63 }
 0x44a   :  { %2584 = vmatmul.mubr.msk.bf16.gmra.mrb[28].mxu1 %vm640_vm2, %v2705_v1 }
 0x44b   :  { %2611 = vmatprep.mubr.msk.bf16.mxu1 %vm407_vm1, %v2710_v42 }
 0x515   :  { %v2581_v7 = vpop.f32.mrb[24].mxu1 }
 0x516   :  { %v993_v8 = vadd.f32 %v2581_v7, %v891_v5  ;;  %v984_v9 = vpop.f32.mrb[25].mxu1 }
 0x517   :  { %v985_v11 = vadd.f32 %v984_v9, %v881_v3  ;;  %v2582_v12 = vpop.f32.mrb[26].mxu1 }
 0x518   :  { %2810 = vtanh.f32 %v993_v8  ;;  %v996_v13 = vadd.f32 %v2582_v12, %v896_v6  ;;  %v987_v14 = vpop.f32.mrb[27].mxu1 }
 0x519   :  { %2812 = vtanh.f32 %v985_v11  ;;  %v988_v16 = vadd.f32 %v987_v14, %v886_v4 }
 0x51a   :  { %2814 = vtanh.f32 %v996_v13 }
 0x51b   :  { %2816 = vtanh.f32 %v988_v16  ;;  %v2711_v16 = vld [vmem:[%s3763_s13 + $0x8] sm:$0xff]  }
 0x51d   :  { %v2585_v18 = vpop.f32.mrb[28].mxu1 }
 0x51e   :  { %v1009_v19 = vadd.f32 %v2585_v18, %v911_v17  ;;  %v1000_v20 = vpop.f32.mrb[29].mxu1  ;;  %v2712_v17 = vld [vmem:[%s3763_s13 + $0x10] sm:$0xff]   ;;  %v2713_v18 = vld [vmem:[%s3763_s13 + $0x18] sm:$0xff]  }
 0x51f   :  { %v1001_v22 = vadd.f32 %v1000_v20, %v901_v10  ;;  %v2586_v23 = vpop.f32.mrb[30].mxu1  ;;  %v2715_v20 = vld [vmem:[%s3763_s13 + $0x28] sm:$0xff]  }
 0x520   :  { %2818 = vtanh.f32 %v1009_v19  ;;  %v1012_v24 = vadd.f32 %v2586_v23, %v916_v21  ;;  %v1003_v25 = vpop.f32.mrb[31].mxu1  ;;  %v2714_v19 = vld [vmem:[%s3763_s13 + $0x20] sm:$0xff]   ;;  %v2716_v21 = vld [vmem:[%s3763_s13 + $0x30] sm:$0xff]  }
 0x521   :  { %2820 = vtanh.f32 %v1001_v22  ;;  %v1004_v26 = vadd.f32 %v1003_v25, %v906_v15  ;;  %v2717_v22 = vld [vmem:[%s3763_s13 + $0x38] ss:$0 sps:$4 sm:$0xff]   ;;  %v2718_v23 = vld [vmem:[%s3764_s15] sm:$0xff]   ;;  %v1230_v25 = vpop.permute.xlu1 %1229 }
 0x522   :  { %v2811_v27 = vpop.eup %2810  ;;  %2822 = vtanh.f32 %v1012_v24  ;;  %v1225_v24 = vpop.permute.xlu0 %1224 }
 0x523   :  { %v2813_v28 = vpop.eup %2812  ;;  %2824 = vtanh.f32 %v1004_v26 }
 0x524   :  { %v2815_v29 = vpop.eup %2814 }
 0x525   :  { %v2817_v30 = vpop.eup %2816  ;;  %v1032_v31 = vpack.c.bf16 %v2815_v29, %v2811_v27  ;;  %v1240_v27 = vpop.permute.xlu1 %1239 }
 0x526   :  { %v1031_v32 = vpack.c.bf16 %v2817_v30, %v2813_v28  ;;  %v1235_v26 = vpop.permute.xlu0 %1234 }
 0x528   :  { %2587 = vmatprep.subr.bf16.mxu0 %v1031_v32 }
 0x529   :  { %2588 = vmatpush3.bf16.msra.mxu0 %v1031_v32  ;;  %v1250_v29 = vpop.permute.xlu1 %1249 }
 0x52a   :  { %v2819_v33 = vpop.eup %2818  ;;  %2589 = vmatprep.subr.bf16.mxu0 %v1032_v31  ;;  %v1245_v28 = vpop.permute.xlu0 %1244 }
 0x52b   :  { %v2821_v34 = vpop.eup %2820 }
 0x52c   :  { %v2823_v35 = vpop.eup %2822 }
 0x52d   :  { %v2825_v36 = vpop.eup %2824  ;;  %2590 = vmatpush3.bf16.msra.mxu0 %v1032_v31  ;;  %v1034_v37 = vpack.c.bf16 %v2823_v35, %v2819_v33 }
 0x52e   :  { %v1033_v38 = vpack.c.bf16 %v2825_v36, %v2821_v34  ;;  %v1255_v30 = vpop.permute.xlu0 %1254 }
 0x530   :  { %2591 = vmatprep.subr.bf16.mxu0 %v1033_v38 }
 0x531   :  { %2592 = vmatpush3.bf16.msra.mxu0 %v1033_v38 }
 0x532   :  { %2593 = vmatprep.subr.bf16.mxu0 %v1034_v37 }
 0x535   :  { %2594 = vmatpush3.bf16.msra.mxu0 %v1034_v37 }
 0x538   :  { %2596 = vmatmul.mubr.msk.bf16.vlgmr.msra.gmra.mrb[24].mxu0 %vm407_vm1, %v2707_v39  ;;  %v1260_v39 = vpop.permute.xlu1 %1259 }
 0x539   :  { %2599 = vmatprep.mubr.msk.bf16.mxu0 %vm407_vm1, %v2708_v40  ;;  %v1265_v40 = vpop.permute.xlu0 %1264 }
 0x540   :  { %2600 = vmatmul.mubr.msk.bf16.gmra.mrb[28].mxu0 %vm407_vm1, %v2709_v41 }
 0x541   :  { %2643 = vmatprep.mubr.msk.bf16.mxu0 %vm1697_vm4, %v2718_v23 }
 0x60b   :  { %v2597_v47 = vpop.f32.mrb[24].mxu0 }
 0x60c   :  { %v1158_v48 = vadd.f32 %v2597_v47, %v1056_v45  ;;  %v1149_v49 = vpop.f32.mrb[25].mxu0 }
 0x60d   :  { %v1150_v51 = vadd.f32 %v1149_v49, %v1046_v43  ;;  %v2598_v52 = vpop.f32.mrb[26].mxu0  ;;  %v1275_v49 = vpop.permute.xlu0 %1274 }
 0x60e   :  { %2826 = vtanh.f32 %v1158_v48  ;;  %v1161_v53 = vadd.f32 %v2598_v52, %v1061_v46  ;;  %v1152_v54 = vpop.f32.mrb[27].mxu0  ;;  %v1270_v46 = vpop.permute.xlu1 %1269 }
 0x60f   :  { %2828 = vtanh.f32 %v1150_v51  ;;  %v1153_v56 = vadd.f32 %v1152_v54, %v1051_v44 }
 0x610   :  { %2830 = vtanh.f32 %v1161_v53 }
 0x611   :  { %2832 = vtanh.f32 %v1153_v56 }
 0x613   :  { %v2601_v58 = vpop.f32.mrb[28].mxu0 }
 0x614   :  { %v1174_v59 = vadd.f32 %v2601_v58, %v1076_v57  ;;  %v1165_v60 = vpop.f32.mrb[29].mxu0  ;;  %v1280_v57 = vpop.permute.xlu1 %1279 }
 0x615   :  { %v1166_v62 = vadd.f32 %v1165_v60, %v1066_v50  ;;  %v2602_v63 = vpop.f32.mrb[30].mxu0 }
 0x616   :  { %2834 = vtanh.f32 %v1174_v59  ;;  %v1177_v1 = vadd.f32 %v2602_v63, %v1081_v61  ;;  %v1168_v2 = vpop.f32.mrb[31].mxu0  ;;  %v1285_v61 = vpop.permute.xlu0 %1284 }
 0x617   :  { %2836 = vtanh.f32 %v1166_v62  ;;  %v1169_v3 = vadd.f32 %v1168_v2, %v1071_v55 }
 0x618   :  { %v2827_v4 = vpop.eup %2826  ;;  %2838 = vtanh.f32 %v1177_v1 }
 0x619   :  { %v2829_v5 = vpop.eup %2828  ;;  %2840 = vtanh.f32 %v1169_v3 }
 0x61a   :  { %v2831_v6 = vpop.eup %2830 }
 0x61b   :  { %v2833_v7 = vpop.eup %2832  ;;  %v1204_v8 = vpack.c.bf16 %v2831_v6, %v2827_v4 }
 0x61c   :  { %v1203_v9 = vpack.c.bf16 %v2833_v7, %v2829_v5 }
 0x61e   :  { %2603 = vmatprep.subr.bf16.mxu1 %v1203_v9 }
 0x61f   :  { %2604 = vmatpush3.bf16.msra.mxu1 %v1203_v9 }
 0x620   :  { %v2835_v10 = vpop.eup %2834  ;;  %2605 = vmatprep.subr.bf16.mxu1 %v1204_v8 }
 0x621   :  { %v2837_v11 = vpop.eup %2836 }
 0x622   :  { %v2839_v12 = vpop.eup %2838 }
 0x623   :  { %v2841_v13 = vpop.eup %2840  ;;  %2606 = vmatpush3.bf16.msra.mxu1 %v1204_v8  ;;  %v1206_v14 = vpack.c.bf16 %v2839_v12, %v2835_v10  ;;  %v1295_v8 = vpop.permute.xlu0 %1294 }
 0x624   :  { %v1205_v15 = vpack.c.bf16 %v2841_v13, %v2837_v11 }
 0x626   :  { %2607 = vmatprep.subr.bf16.mxu1 %v1205_v15 }
 0x627   :  { %2608 = vmatpush3.bf16.msra.mxu1 %v1205_v15 }
 0x628   :  { %2609 = vmatprep.subr.bf16.mxu1 %v1206_v14 }
 0x62b   :  { %2610 = vmatpush3.bf16.msra.mxu1 %v1206_v14 }
 0x62c   :  { %2113 = vmatprep.subr.bf16.mxu1 %v2950_v0 }
 0x62e   :  { %2612 = vmatmul.mubr.msk.bf16.vlgmr.msra.gmra.mrb[32].mxu1 %vm407_vm1, %v2711_v16  ;;  %v1290_v16 = vpop.permute.xlu1 %1289 }
 0x62f   :  { %2615 = vmatprep.mubr.msk.bf16.mxu1 %vm407_vm1, %v2712_v17 }
 0x636   :  { %2616 = vmatmul.mubr.msk.bf16.gmra.mrb[36].mxu1 %vm407_vm1, %v2713_v18 }
 0x637   :  { %2619 = vmatprep.mubr.msk.bf16.mxu1 %vm407_vm1, %v2714_v19 }
 0x63e   :  { %2620 = vmatmul.mubr.msk.bf16.gmra.mrb[40].mxu1 %vm407_vm1, %v2715_v20 }
 0x63f   :  { %2623 = vmatprep.mubr.msk.bf16.mxu1 %vm407_vm1, %v2716_v21 }
 0x646   :  { %2624 = vmatmul.mubr.msk.bf16.gmra.mrb[44].mxu1 %vm407_vm1, %v2717_v22 }
 0x701   :  { %v2613_v31 = vpop.f32.mrb[32].mxu1 }
 0x702   :  { %v1402_v32 = vadd.f32 %v2613_v31, %v1235_v26  ;;  %v1393_v33 = vpop.f32.mrb[33].mxu1  ;;  %v2719_v31 = vld [vmem:[%s3764_s15 + $0x8] sm:$0xff]  }
 0x703   :  { %v1394_v34 = vadd.f32 %v1393_v33, %v1225_v24  ;;  %v2614_v35 = vpop.f32.mrb[34].mxu1  ;;  %v2721_v33 = vld [vmem:[%s3764_s15 + $0x18] sm:$0xff]  }
 0x704   :  { %2842 = vtanh.f32 %v1402_v32  ;;  %v1405_v36 = vadd.f32 %v2614_v35, %v1240_v27  ;;  %v1396_v37 = vpop.f32.mrb[35].mxu1  ;;  %v2720_v32 = vld [vmem:[%s3764_s15 + $0x10] sm:$0xff]   ;;  %v2723_v35 = vld [vmem:[%s3764_s15 + $0x28] sm:$0xff]  }
 0x705   :  { %2844 = vtanh.f32 %v1394_v34  ;;  %v1397_v38 = vadd.f32 %v1396_v37, %v1230_v25  ;;  %v2722_v34 = vld [vmem:[%s3764_s15 + $0x20] sm:$0xff]   ;;  %v2725_v37 = vld [vmem:[%s3764_s15 + $0x38] sm:$0xff]  }
 0x706   :  { %2846 = vtanh.f32 %v1405_v36  ;;  %v2724_v36 = vld [vmem:[%s3764_s15 + $0x30] sm:$0xff]  }
 0x707   :  { %2848 = vtanh.f32 %v1397_v38  ;;  %v2726_v38 = vld [vmem:[%s3764_s15 + $0x40] sm:$0xff]  }
 0x709   :  { %v2617_v41 = vpop.f32.mrb[36].mxu1 }
 0x70a   :  { %v1418_v42 = vadd.f32 %v2617_v41, %v1255_v30  ;;  %v1409_v43 = vpop.f32.mrb[37].mxu1  ;;  %v2729_v41 = vld [vmem:[%s3764_s15 + $0x58] ss:$0 sps:$4 sm:$0xff]  }
 0x70b   :  { %v1410_v44 = vadd.f32 %v1409_v43, %v1245_v28  ;;  %v2618_v45 = vpop.f32.mrb[38].mxu1  ;;  %v1527_v43 = vpop.permute.xlu1 %1526 }
 0x70c   :  { %2850 = vtanh.f32 %v1418_v42  ;;  %v1421_v47 = vadd.f32 %v2618_v45, %v1260_v39  ;;  %v1412_v48 = vpop.f32.mrb[39].mxu1  ;;  %v2727_v39 = vld [vmem:[%s3764_s15 + $0x48] sm:$0xff]   ;;  %v1532_v45 = vpop.permute.xlu0 %1531 }
 0x70d   :  { %2852 = vtanh.f32 %v1410_v44  ;;  %v1413_v50 = vadd.f32 %v1412_v48, %v1250_v29  ;;  %v2732_v42 = vld [vmem:[%s3765_s17 + $0x4] ss:$8 sps:$4 sm:$0xff]  }
 0x70e   :  { %v2843_v51 = vpop.eup %2842  ;;  %2854 = vtanh.f32 %v1421_v47  ;;  %2392 = vmatprep.mubr.msk.bf16.mxu1 %vm2085_vm6, %v2732_v42 }
 0x70f   :  { %v2845_v52 = vpop.eup %2844  ;;  %2856 = vtanh.f32 %v1413_v50  ;;  %v1537_v44 = vpop.permute.xlu1 %1536 }
 0x710   :  { %v2847_v53 = vpop.eup %2846  ;;  %v1542_v47 = vpop.permute.xlu0 %1541 }
 0x711   :  { %v2849_v54 = vpop.eup %2848  ;;  %v2621_v55 = vpop.f32.mrb[40].mxu1  ;;  %v1494_v56 = vpack.c.bf16 %v2847_v53, %v2843_v51 }
 0x712   :  { %v1434_v58 = vadd.f32 %v2621_v55, %v1275_v49  ;;  %v1425_v59 = vpop.f32.mrb[41].mxu1  ;;  %v1493_v60 = vpack.c.bf16 %v2849_v54, %v2845_v52 }
 0x713   :  { %v1426_v62 = vadd.f32 %v1425_v59, %v1265_v40  ;;  %v2622_v63 = vpop.f32.mrb[42].mxu1  ;;  %v2728_v40 = vld [vmem:[%s3764_s15 + $0x50] sm:$0xff]  }
 0x714   :  { %2858 = vtanh.f32 %v1434_v58  ;;  %v1437_v1 = vadd.f32 %v2622_v63, %v1280_v57  ;;  %v1428_v2 = vpop.f32.mrb[43].mxu1  ;;  %2627 = vmatprep.subr.bf16.mxu0 %v1493_v60  ;;  %v1552_v49 = vpop.permute.xlu0 %1551 }
 0x715   :  { %2860 = vtanh.f32 %v1426_v62  ;;  %v1429_v3 = vadd.f32 %v1428_v2, %v1270_v46  ;;  %2628 = vmatpush3.bf16.msra.mxu0 %v1493_v60  ;;  %v1547_v46 = vpop.permute.xlu1 %1546 }
 0x716   :  { %v2851_v4 = vpop.eup %2850  ;;  %2862 = vtanh.f32 %v1437_v1  ;;  %2629 = vmatprep.subr.bf16.mxu0 %v1494_v56 }
 0x717   :  { %v2853_v5 = vpop.eup %2852  ;;  %2864 = vtanh.f32 %v1429_v3 }
 0x718   :  { %v2855_v6 = vpop.eup %2854  ;;  %v1562_v51 = vpop.permute.xlu0 %1561 }
 0x719   :  { %v2857_v7 = vpop.eup %2856  ;;  %v2625_v9 = vpop.f32.mrb[44].mxu1  ;;  %2630 = vmatpush3.bf16.msra.mxu0 %v1494_v56  ;;  %v1496_v10 = vpack.c.bf16 %v2855_v6, %v2851_v4 }
 0x71a   :  { %v1450_v11 = vadd.f32 %v2625_v9, %v1295_v8  ;;  %v1441_v12 = vpop.f32.mrb[45].mxu1  ;;  %v1495_v13 = vpack.c.bf16 %v2857_v7, %v2853_v5  ;;  %v1557_v48 = vpop.permute.xlu1 %1556 }
 0x71b   :  { %v1442_v14 = vadd.f32 %v1441_v12, %v1285_v61  ;;  %v2626_v15 = vpop.f32.mrb[46].mxu1 }
 0x71c   :  { %v1444_v17 = vpop.f32.mrb[47].mxu1  ;;  %2631 = vmatprep.subr.bf16.mxu0 %v1495_v13  ;;  %2866 = vtanh.f32 %v1450_v11  ;;  %v1572_v60 = vpop.permute.xlu0 %1571 }
 0x71d   :  { %v1445_v18 = vadd.f32 %v1444_v17, %v1290_v16  ;;  %2632 = vmatpush3.bf16.msra.mxu0 %v1495_v13  ;;  %2868 = vtanh.f32 %v1442_v14 }
 0x71e   :  { %v2859_v19 = vpop.eup %2858  ;;  %2633 = vmatprep.subr.bf16.mxu0 %v1496_v10  ;;  %v1567_v50 = vpop.permute.xlu1 %1566 }
 0x71f   :  { %v2861_v20 = vpop.eup %2860  ;;  %2870 = vtanh.f32 %v1445_v18 }
 0x720   :  { %v2863_v21 = vpop.eup %2862  ;;  %v1582_v3 = vpop.permute.xlu0 %1581 }
 0x721   :  { %v2865_v22 = vpop.eup %2864  ;;  %2634 = vmatpush3.bf16.msra.mxu0 %v1496_v10  ;;  %v1498_v23 = vpack.c.bf16 %v2863_v21, %v2859_v19 }
 0x722   :  { %v1497_v24 = vpack.c.bf16 %v2865_v22, %v2861_v20  ;;  %v1577_v57 = vpop.permute.xlu1 %1576 }
 0x724   :  { %2635 = vmatprep.subr.bf16.mxu0 %v1497_v24  ;;  %v1592_v14 = vpop.permute.xlu0 %1591 }
 0x725   :  { %2636 = vmatpush3.bf16.msra.mxu0 %v1497_v24 }
 0x726   :  { %2637 = vmatprep.subr.bf16.mxu0 %v1498_v23  ;;  %v2867_v25 = vpop.eup %2866  ;;  %v1587_v63 = vpop.permute.xlu1 %1586 }
 0x727   :  { %v2869_v26 = vpop.eup %2868  ;;  %v1500_v29 = vpack.c.bf16 %v2867_v25, %v2867_v25 }
 0x729   :  { %v2871_v27 = vpop.eup %2870  ;;  %2638 = vmatpush3.bf16.msra.mxu0 %v1498_v23  ;;  %v1736_v30 = vsel %vm1734_vm5, %v1500_v29, 0 }
 0x72a   :  { %v1499_v28 = vpack.c.bf16 %v2871_v27, %v2869_v26  ;;  %v1597_v12 = vpop.permute.xlu1 %1596 }
 0x72c   :  { %2639 = vmatprep.subr.bf16.mxu0 %v1499_v28 }
 0x72d   :  { %2640 = vmatpush3.bf16.msra.mxu0 %v1499_v28  ;;  %v1602_v28 = vpop.permute.xlu0 %1601 }
 0x72e   :  { %2675 = vmatprep.subr.msk.bf16.mxu0 %vm1734_vm5, %v1500_v29  ;;  %v1607_v26 = vpop.permute.xlu1 %1606 }
 0x731   :  { %2642 = vmatpush3.bf16.msra.mxu0 %v1736_v30 }
 0x734   :  { %2644 = vmatmul.mubr.msk.bf16.vlgmr.msra.gmra.mrb[32].mxu0 %vm1697_vm4, %v2719_v31 }
 0x735   :  { %2647 = vmatprep.mubr.msk.bf16.mxu0 %vm1697_vm4, %v2720_v32 }
 0x73c   :  { %2648 = vmatmul.mubr.msk.bf16.gmra.mrb[36].mxu0 %vm1697_vm4, %v2721_v33 }
 0x73d   :  { %2651 = vmatprep.mubr.msk.bf16.mxu0 %vm1697_vm4, %v2722_v34 }
 0x744   :  { %2652 = vmatmul.mubr.msk.bf16.gmra.mrb[40].mxu0 %vm1697_vm4, %v2723_v35 }
 0x745   :  { %2655 = vmatprep.mubr.msk.bf16.mxu0 %vm1697_vm4, %v2724_v36 }
 0x74c   :  { %2656 = vmatmul.mubr.msk.bf16.gmra.mrb[44].mxu0 %vm1697_vm4, %v2725_v37 }
 0x74d   :  { %2659 = vmatprep.mubr.msk.bf16.mxu0 %vm1697_vm4, %v2726_v38  ;;  %v1617_v38 = vpop.permute.xlu1 %1616 }
 0x754   :  { %2660 = vmatmul.mubr.msk.bf16.gmra.mrb[48].mxu0 %vm1697_vm4, %v2727_v39 }
 0x755   :  { %2663 = vmatprep.mubr.msk.bf16.mxu0 %vm1697_vm4, %v2728_v40 }
 0x75c   :  { %2664 = vmatmul.mubr.msk.bf16.gmra.mrb[52].mxu0 %vm1697_vm4, %v2729_v41  ;;  %v1612_v41 = vpop.permute.xlu0 %1611 }
 0x807   :  { %v2645_v52 = vpop.f32.mrb[32].mxu0 }
 0x808   :  { %v1781_v53 = vadd.f32 %v2645_v52, %v1537_v44  ;;  %v1772_v54 = vpop.f32.mrb[33].mxu0 }
 0x809   :  { %v1773_v55 = vadd.f32 %v1772_v54, %v1527_v43  ;;  %v2646_v56 = vpop.f32.mrb[34].mxu0 }
 0x80a   :  { %2872 = vtanh.f32 %v1781_v53  ;;  %v1784_v58 = vadd.f32 %v2646_v56, %v1542_v47  ;;  %v1775_v59 = vpop.f32.mrb[35].mxu0  ;;  %v1622_v53 = vpop.permute.xlu0 %1621 }
 0x80b   :  { %2874 = vtanh.f32 %v1773_v55  ;;  %v1776_v61 = vadd.f32 %v1775_v59, %v1532_v45 }
 0x80c   :  { %2876 = vtanh.f32 %v1784_v58 }
 0x80d   :  { %2878 = vtanh.f32 %v1776_v61 }
 0x80f   :  { %v2649_v62 = vpop.f32.mrb[36].mxu0 }
 0x810   :  { %v1797_v1 = vadd.f32 %v2649_v62, %v1557_v48  ;;  %v1788_v2 = vpop.f32.mrb[37].mxu0 }
 0x811   :  { %v1789_v4 = vadd.f32 %v1788_v2, %v1547_v46  ;;  %v2650_v5 = vpop.f32.mrb[38].mxu0 }
 0x812   :  { %2880 = vtanh.f32 %v1797_v1  ;;  %v1800_v6 = vadd.f32 %v2650_v5, %v1562_v51  ;;  %v1791_v7 = vpop.f32.mrb[39].mxu0 }
 0x813   :  { %2882 = vtanh.f32 %v1789_v4  ;;  %v1792_v8 = vadd.f32 %v1791_v7, %v1552_v49  ;;  %v1627_v49 = vpop.permute.xlu1 %1626 }
 0x814   :  { %v2873_v9 = vpop.eup %2872  ;;  %2884 = vtanh.f32 %v1800_v6 }
 0x815   :  { %v2875_v10 = vpop.eup %2874  ;;  %2886 = vtanh.f32 %v1792_v8  ;;  %v1632_v8 = vpop.permute.xlu0 %1631 }
 0x816   :  { %v2877_v11 = vpop.eup %2876 }
 0x817   :  { %v2879_v13 = vpop.eup %2878  ;;  %v2653_v15 = vpop.f32.mrb[40].mxu0  ;;  %v1906_v16 = vpack.c.bf16 %v2877_v11, %v2873_v9 }
 0x818   :  { %v1813_v17 = vadd.f32 %v2653_v15, %v1577_v57  ;;  %v1804_v18 = vpop.f32.mrb[41].mxu0  ;;  %v1905_v19 = vpack.c.bf16 %v2879_v13, %v2875_v10 }
 0x819   :  { %v1805_v20 = vadd.f32 %v1804_v18, %v1567_v50  ;;  %v2654_v21 = vpop.f32.mrb[42].mxu0 }
 0x81a   :  { %2888 = vtanh.f32 %v1813_v17  ;;  %v1816_v22 = vadd.f32 %v2654_v21, %v1582_v3  ;;  %v1807_v23 = vpop.f32.mrb[43].mxu0  ;;  %2114 = vmatpush1.bf16.msra.mxu1 %v1905_v19 }
 0x81b   :  { %2890 = vtanh.f32 %v1805_v20  ;;  %v1808_v24 = vadd.f32 %v1807_v23, %v1572_v60  ;;  %2115 = vmatprep.subr.bf16.mxu1 %v2950_v0  ;;  %v2730_v23 = vld [vmem:[%s3765_s17] ss:$8 sps:$4 sm:$0xff]  }
 0x81c   :  { %v2881_v25 = vpop.eup %2880  ;;  %2892 = vtanh.f32 %v1816_v22 }
 0x81d   :  { %v2883_v27 = vpop.eup %2882  ;;  %2894 = vtanh.f32 %v1808_v24  ;;  %v2733_v24 = vld [vmem:[%s3765_s17 + $0x14] ss:$8 sps:$4 sm:$0xff]  }
 0x81e   :  { %v2885_v29 = vpop.eup %2884  ;;  %2116 = vmatpush1.bf16.msra.mxu1 %v1906_v16 }
 0x81f   :  { %v2887_v30 = vpop.eup %2886  ;;  %v2657_v31 = vpop.f32.mrb[44].mxu0  ;;  %2117 = vmatprep.subr.bf16.mxu1 %v2950_v0  ;;  %v1908_v32 = vpack.c.bf16 %v2885_v29, %v2881_v25  ;;  %v2735_v25 = vld [vmem:[%s3765_s17 + $0x10] ss:$8 sps:$4 sm:$0xff]   ;;  %v2742_v29 = vld [vmem:[%s3765_s17 + $0x44] ss:$8 sps:$4 sm:$0xff]  }
 0x820   :  { %v1829_v33 = vadd.f32 %v2657_v31, %v1597_v12  ;;  %v1820_v34 = vpop.f32.mrb[45].mxu0  ;;  %v1907_v35 = vpack.c.bf16 %v2887_v30, %v2883_v27  ;;  %v2739_v27 = vld [vmem:[%s3765_s17 + $0x34] ss:$8 sps:$4 sm:$0xff]   ;;  %v2744_v30 = vld [vmem:[%s3765_s17 + $0x40] ss:$8 sps:$4 sm:$0xff]  }
 0x821   :  { %v1821_v36 = vadd.f32 %v1820_v34, %v1587_v63  ;;  %v2658_v37 = vpop.f32.mrb[46].mxu0  ;;  %v1637_v63 = vpop.permute.xlu1 %1636  ;;  %v2745_v31 = vld [vmem:[%s3765_s17 + $0x54] ss:$8 sps:$4 sm:$0xff]   ;;  %v2750_v34 = vld [vmem:[%s3765_s17 + $0x60] ss:$8 sps:$4 sm:$0xff]  }
 0x822   :  { %2896 = vtanh.f32 %v1829_v33  ;;  %v1832_v39 = vadd.f32 %v2658_v37, %v1602_v28  ;;  %v1823_v40 = vpop.f32.mrb[47].mxu0  ;;  %2118 = vmatpush1.bf16.msra.mxu1 %v1907_v35  ;;  %v2741_v28 = vld [vmem:[%s3765_s17 + $0x30] ss:$8 sps:$4 sm:$0xff]   ;;  %v2748_v33 = vld [vmem:[%s3765_s17 + $0x64] ss:$8 sps:$4 sm:$0xff]   ;;  %v1936_v37 = vpop.permute.xlu0 %1935 }
 0x823   :  { %2898 = vtanh.f32 %v1821_v36  ;;  %v1824_v42 = vadd.f32 %v1823_v40, %v1592_v14  ;;  %2119 = vmatprep.subr.bf16.mxu1 %v2950_v0  ;;  %v2751_v35 = vld [vmem:[%s3765_s17 + $0x74] ss:$8 sps:$4 sm:$0xff]   ;;  %v2753_v36 = vld [vmem:[%s3765_s17 + $0x70] ss:$8 sps:$4 sm:$0xff]  }
 0x824   :  { %v2889_v43 = vpop.eup %2888  ;;  %2900 = vtanh.f32 %v1832_v39 }
 0x825   :  { %v2891_v44 = vpop.eup %2890  ;;  %2902 = vtanh.f32 %v1824_v42 }
 0x826   :  { %v2893_v45 = vpop.eup %2892  ;;  %2120 = vmatpush1.bf16.msra.mxu1 %v1908_v32  ;;  %v2747_v32 = vld [vmem:[%s3765_s17 + $0x50] ss:$8 sps:$4 sm:$0xff]  }
 0x827   :  { %v2895_v46 = vpop.eup %2894  ;;  %v2661_v47 = vpop.f32.mrb[48].mxu0  ;;  %2121 = vmatprep.subr.bf16.mxu1 %v2950_v0  ;;  %v1910_v48 = vpack.c.bf16 %v2893_v45, %v2889_v43 }
 0x828   :  { %v1845_v50 = vadd.f32 %v2661_v47, %v1617_v38  ;;  %v1836_v51 = vpop.f32.mrb[49].mxu0  ;;  %v1909_v52 = vpack.c.bf16 %v2895_v46, %v2891_v44  ;;  %v1941_v43 = vpop.permute.xlu1 %1940 }
 0x829   :  { %v1837_v54 = vadd.f32 %v1836_v51, %v1607_v26  ;;  %v2662_v55 = vpop.f32.mrb[50].mxu0  ;;  %v2738_v26 = vld [vmem:[%s3765_s17 + $0x20] ss:$8 sps:$4 sm:$0xff]   ;;  %v1946_v45 = vpop.permute.xlu0 %1945 }
 0x82a   :  { %2904 = vtanh.f32 %v1845_v50  ;;  %v1848_v56 = vadd.f32 %v2662_v55, %v1622_v53  ;;  %v1839_v57 = vpop.f32.mrb[51].mxu0  ;;  %2122 = vmatpush1.bf16.msra.mxu1 %v1909_v52 }
 0x82b   :  { %2906 = vtanh.f32 %v1837_v54  ;;  %v1840_v58 = vadd.f32 %v1839_v57, %v1612_v41  ;;  %2123 = vmatprep.subr.bf16.mxu1 %v2950_v0 }
 0x82c   :  { %v2897_v59 = vpop.eup %2896  ;;  %2908 = vtanh.f32 %v1848_v56  ;;  %v1951_v51 = vpop.permute.xlu1 %1950 }
 0x82d   :  { %v2899_v60 = vpop.eup %2898  ;;  %2910 = vtanh.f32 %v1840_v58  ;;  %v1956_v53 = vpop.permute.xlu0 %1955 }
 0x82e   :  { %v2901_v61 = vpop.eup %2900  ;;  %2124 = vmatpush1.bf16.msra.mxu1 %v1910_v48 }
 0x82f   :  { %v2903_v62 = vpop.eup %2902  ;;  %v2665_v1 = vpop.f32.mrb[52].mxu0  ;;  %2125 = vmatprep.subr.bf16.mxu1 %v2950_v0  ;;  %v1912_v2 = vpack.c.bf16 %v2901_v61, %v2897_v59 }
 0x830   :  { %v1861_v3 = vadd.f32 %v2665_v1, %v1637_v63  ;;  %v1852_v4 = vpop.f32.mrb[53].mxu0  ;;  %v1911_v5 = vpack.c.bf16 %v2903_v62, %v2899_v60  ;;  %v1961_v59 = vpop.permute.xlu1 %1960 }
 0x831   :  { %v1853_v6 = vadd.f32 %v1852_v4, %v1627_v49  ;;  %v2666_v7 = vpop.f32.mrb[54].mxu0  ;;  %v1966_v61 = vpop.permute.xlu0 %1965 }
 0x832   :  { %v1855_v9 = vpop.f32.mrb[55].mxu0  ;;  %2126 = vmatpush1.bf16.msra.mxu1 %v1911_v5  ;;  %2912 = vtanh.f32 %v1861_v3 }
 0x833   :  { %v1856_v10 = vadd.f32 %v1855_v9, %v1632_v8  ;;  %2127 = vmatprep.subr.bf16.mxu1 %v2950_v0  ;;  %2914 = vtanh.f32 %v1853_v6 }
 0x834   :  { %v2905_v11 = vpop.eup %2904  ;;  %v1971_v4 = vpop.permute.xlu1 %1970 }
 0x835   :  { %v2907_v12 = vpop.eup %2906  ;;  %2916 = vtanh.f32 %v1856_v10  ;;  %v1976_v6 = vpop.permute.xlu0 %1975 }
 0x836   :  { %v2909_v13 = vpop.eup %2908  ;;  %2128 = vmatpush1.bf16.msra.mxu1 %v1912_v2 }
 0x837   :  { %v2911_v14 = vpop.eup %2910  ;;  %2129 = vmatprep.subr.bf16.mxu1 %v2950_v0  ;;  %v1914_v15 = vpack.c.bf16 %v2909_v13, %v2905_v11 }
 0x838   :  { %v1913_v16 = vpack.c.bf16 %v2911_v14, %v2907_v12  ;;  %v1981_v12 = vpop.permute.xlu1 %1980 }
 0x839   :  { %v1986_v14 = vpop.permute.xlu0 %1985 }
 0x83a   :  { %2130 = vmatpush1.bf16.msra.mxu1 %v1913_v16 }
 0x83b   :  { %2131 = vmatprep.subr.bf16.mxu1 %v2950_v0 }
 0x83c   :  { %v2913_v17 = vpop.eup %2912 }
 0x83d   :  { %v2915_v18 = vpop.eup %2914  ;;  %v1916_v21 = vpack.c.bf16 %v2913_v17, %v2913_v17 }
 0x83e   :  { %2132 = vmatpush1.bf16.msra.mxu1 %v1914_v15 }
 0x83f   :  { %v2917_v19 = vpop.eup %2916  ;;  %2133 = vmatprep.subr.bf16.mxu1 %v2950_v0  ;;  %v2111_v22 = vsel %vm1734_vm5, %v1916_v21, 0 }
 0x840   :  { %v1915_v20 = vpack.c.bf16 %v2917_v19, %v2915_v18 }
 0x842   :  { %2134 = vmatpush1.bf16.msra.mxu1 %v1915_v20  ;;  %v1991_v20 = vpop.permute.xlu1 %1990 }
 0x843   :  { %2135 = vmatprep.subr.bf16.mxu1 %v2950_v0  ;;  %v2736_v0 = vld [vmem:[%s3765_s17 + $0x24] ss:$8 sps:$4 sm:$0xff]  }
 0x846   :  { %2136 = vmatpush1.bf16.msra.mxu1 %v2111_v22  ;;  %v1996_v22 = vpop.permute.xlu0 %1995 }
 0x849   :  { %2146 = vmatmul.mubr.bf16.vlgmr.msra.gmra.mrb[48].mxu1 %v2730_v23 }
 0x84a   :  { %2393 = vmatprep.mubr.msk.bf16.mxu1 %vm2085_vm6, %v2733_v24 }
 0x851   :  { %2154 = vmatmul.mubr.bf16.gmra.mrb[52].mxu1 %v2735_v25 }
 0x852   :  { %2394 = vmatprep.mubr.msk.bf16.mxu1 %vm2085_vm6, %v2736_v0 }
 0x859   :  { %2162 = vmatmul.mubr.bf16.gmra.mrb[56].mxu1 %v2738_v26 }
 0x85a   :  { %2395 = vmatprep.mubr.msk.bf16.mxu1 %vm2085_vm6, %v2739_v27  ;;  %v2001_v27 = vpop.permute.xlu1 %2000 }
 0x861   :  { %2170 = vmatmul.mubr.bf16.gmra.mrb[60].mxu1 %v2741_v28 }
 0x862   :  { %2396 = vmatprep.mubr.msk.bf16.mxu1 %vm2085_vm6, %v2742_v29  ;;  %v2006_v29 = vpop.permute.xlu0 %2005 }
 0x869   :  { %2178 = vmatmul.mubr.bf16.gmra.mrb[64].mxu1 %v2744_v30 }
 0x86a   :  { %2397 = vmatprep.mubr.msk.bf16.mxu1 %vm2085_vm6, %v2745_v31 }
 0x871   :  { %2186 = vmatmul.mubr.bf16.gmra.mrb[68].mxu1 %v2747_v32 }
 0x872   :  { %2398 = vmatprep.mubr.msk.bf16.mxu1 %vm2085_vm6, %v2748_v33 }
 0x879   :  { %2194 = vmatmul.mubr.bf16.gmra.mrb[72].mxu1 %v2750_v34 }
 0x87a   :  { %2399 = vmatprep.mubr.msk.bf16.mxu1 %vm2085_vm6, %v2751_v35  ;;  %v2011_v35 = vpop.permute.xlu1 %2010 }
 0x881   :  { %2202 = vmatmul.mubr.bf16.gmra.mrb[76].mxu1 %v2753_v36 }
 0x91c   :  { %v2147_v38 = vpop.f32.mrb[48].mxu1 }
 0x91d   :  { %v2148_v39 = vadd.f32 %v2147_v38, %v1936_v37  ;;  %v2149_v40 = vpop.f32.mrb[49].mxu1 }
 0x91e   :  { %v2150_v41 = vpop.f32.mrb[50].mxu1 }
 0x91f   :  { %2210 = vxpose.xlu0.b32.start [1/16] %v2148_v39, 128  ;;  %v2152_v42 = vpop.f32.mrb[51].mxu1  ;;  %v2151_v44 = vadd.f32 %v2150_v41, %v1941_v43 }
 0x923   :  { %2211 = vxpose.xlu0.b32.cont [2/16] %v2151_v44, 128 }
 0x924   :  { %v2155_v46 = vpop.f32.mrb[52].mxu1 }
 0x925   :  { %v2156_v47 = vadd.f32 %v2155_v46, %v1946_v45  ;;  %v2157_v48 = vpop.f32.mrb[53].mxu1 }
 0x926   :  { %v2158_v49 = vpop.f32.mrb[54].mxu1 }
 0x927   :  { %2212 = vxpose.xlu0.b32.cont [3/16] %v2156_v47, 128  ;;  %v2160_v50 = vpop.f32.mrb[55].mxu1  ;;  %v2159_v52 = vadd.f32 %v2158_v49, %v1951_v51 }
 0x92b   :  { %2213 = vxpose.xlu0.b32.cont [4/16] %v2159_v52, 128 }
 0x92c   :  { %v2163_v54 = vpop.f32.mrb[56].mxu1 }
 0x92d   :  { %v2164_v55 = vadd.f32 %v2163_v54, %v1956_v53  ;;  %v2165_v56 = vpop.f32.mrb[57].mxu1 }
 0x92e   :  { %v2166_v57 = vpop.f32.mrb[58].mxu1 }
 0x92f   :  { %2214 = vxpose.xlu0.b32.cont [5/16] %v2164_v55, 128  ;;  %v2168_v58 = vpop.f32.mrb[59].mxu1  ;;  %v2167_v60 = vadd.f32 %v2166_v57, %v1961_v59 }
 0x933   :  { %2215 = vxpose.xlu0.b32.cont [6/16] %v2167_v60, 128 }
 0x934   :  { %v2171_v62 = vpop.f32.mrb[60].mxu1 }
 0x935   :  { %v2172_v63 = vadd.f32 %v2171_v62, %v1966_v61  ;;  %v2173_v1 = vpop.f32.mrb[61].mxu1 }
 0x936   :  { %v2174_v2 = vpop.f32.mrb[62].mxu1 }
 0x937   :  { %2216 = vxpose.xlu0.b32.cont [7/16] %v2172_v63, 128  ;;  %v2176_v3 = vpop.f32.mrb[63].mxu1  ;;  %v2175_v5 = vadd.f32 %v2174_v2, %v1971_v4 }
 0x93b   :  { %2217 = vxpose.xlu0.b32.cont [8/16] %v2175_v5, 128 }
 0x93c   :  { %v2179_v7 = vpop.f32.mrb[64].mxu1 }
 0x93d   :  { %v2180_v8 = vadd.f32 %v2179_v7, %v1976_v6  ;;  %v2181_v9 = vpop.f32.mrb[65].mxu1 }
 0x93e   :  { %v2182_v10 = vpop.f32.mrb[66].mxu1 }
 0x93f   :  { %2218 = vxpose.xlu0.b32.cont [9/16] %v2180_v8, 128  ;;  %v2184_v11 = vpop.f32.mrb[67].mxu1  ;;  %v2183_v13 = vadd.f32 %v2182_v10, %v1981_v12 }
 0x943   :  { %2219 = vxpose.xlu0.b32.cont [10/16] %v2183_v13, 128 }
 0x944   :  { %v2187_v15 = vpop.f32.mrb[68].mxu1 }
 0x945   :  { %v2188_v16 = vadd.f32 %v2187_v15, %v1986_v14  ;;  %v2189_v17 = vpop.f32.mrb[69].mxu1 }
 0x946   :  { %v2190_v18 = vpop.f32.mrb[70].mxu1 }
 0x947   :  { %2220 = vxpose.xlu0.b32.cont [11/16] %v2188_v16, 128  ;;  %v2192_v19 = vpop.f32.mrb[71].mxu1  ;;  %v2191_v21 = vadd.f32 %v2190_v18, %v1991_v20 }
 0x94b   :  { %2221 = vxpose.xlu0.b32.cont [12/16] %v2191_v21, 128 }
 0x94c   :  { %v2195_v23 = vpop.f32.mrb[72].mxu1 }
 0x94d   :  { %v2196_v24 = vadd.f32 %v2195_v23, %v1996_v22  ;;  %v2197_v25 = vpop.f32.mrb[73].mxu1 }
 0x94e   :  { %v2198_v0 = vpop.f32.mrb[74].mxu1 }
 0x94f   :  { %2222 = vxpose.xlu0.b32.cont [13/16] %v2196_v24, 128  ;;  %v2200_v26 = vpop.f32.mrb[75].mxu1  ;;  %v2199_v28 = vadd.f32 %v2198_v0, %v2001_v27 }
 0x953   :  { %2223 = vxpose.xlu0.b32.cont [14/16] %v2199_v28, 128 }
 0x954   :  { %v2203_v30 = vpop.f32.mrb[76].mxu1 }
 0x955   :  { %v2204_v31 = vadd.f32 %v2203_v30, %v2006_v29  ;;  %v2205_v32 = vpop.f32.mrb[77].mxu1 }
 0x956   :  { %v2206_v33 = vpop.f32.mrb[78].mxu1 }
 0x957   :  { %2224 = vxpose.xlu0.b32.cont [15/16] %v2204_v31, 128  ;;  %v2208_v34 = vpop.f32.mrb[79].mxu1  ;;  %v2207_v36 = vadd.f32 %v2206_v33, %v2011_v35 }
 0x95b   :  { %2225 = vxpose.xlu0.b32.end [16/16] %v2207_v36, 128 }
 0x99f   :  { %v2226_v37 = vpop.trf.xlu0 }
 0x9a0   :  { %2918 = vtanh.f32 %v2226_v37 }
 0x9a3   :  { %v2227_v38 = vpop.trf.xlu0 }
 0x9a4   :  { %2920 = vtanh.f32 %v2227_v38 }
 0x9a7   :  { %v2228_v39 = vpop.trf.xlu0 }
 0x9a8   :  { %2922 = vtanh.f32 %v2228_v39 }
 0x9aa   :  { %v2919_v40 = vpop.eup %2918 }
 0x9ab   :  { %2258 = vst.msk [vmem:[%s3766_s19] sm:$0xff] %vm143_vm0, %v2919_v40  ;;  %v2229_v41 = vpop.trf.xlu0 }
 0x9ac   :  { %2924 = vtanh.f32 %v2229_v41 }
 0x9ae   :  { %v2921_v42 = vpop.eup %2920 }
 0x9af   :  { %2259 = vst.msk [vmem:[%s3766_s19 + $0x8] sm:$0xff] %vm143_vm0, %v2921_v42  ;;  %v2230_v43 = vpop.trf.xlu0 }
 0x9b0   :  { %2926 = vtanh.f32 %v2230_v43 }
 0x9b2   :  { %v2923_v44 = vpop.eup %2922 }
 0x9b3   :  { %2260 = vst.msk [vmem:[%s3766_s19 + $0x10] sm:$0xff] %vm143_vm0, %v2923_v44  ;;  %v2231_v45 = vpop.trf.xlu0 }
 0x9b4   :  { %2928 = vtanh.f32 %v2231_v45 }
 0x9b6   :  { %v2925_v46 = vpop.eup %2924 }
 0x9b7   :  { %2261 = vst.msk [vmem:[%s3766_s19 + $0x18] sm:$0xff] %vm143_vm0, %v2925_v46  ;;  %v2232_v47 = vpop.trf.xlu0 }
 0x9b8   :  { %2930 = vtanh.f32 %v2232_v47 }
 0x9ba   :  { %v2927_v48 = vpop.eup %2926 }
 0x9bb   :  { %2262 = vst.msk [vmem:[%s3766_s19 + $0x20] sm:$0xff] %vm143_vm0, %v2927_v48  ;;  %v2233_v49 = vpop.trf.xlu0 }
 0x9bc   :  { %2932 = vtanh.f32 %v2233_v49 }
 0x9be   :  { %v2929_v50 = vpop.eup %2928 }
 0x9bf   :  { %2263 = vst.msk [vmem:[%s3766_s19 + $0x28] sm:$0xff] %vm143_vm0, %v2929_v50  ;;  %v2234_v51 = vpop.trf.xlu0 }
 0x9c0   :  { %2934 = vtanh.f32 %v2234_v51 }
 0x9c2   :  { %v2931_v52 = vpop.eup %2930 }
 0x9c3   :  { %2264 = vst.msk [vmem:[%s3766_s19 + $0x30] sm:$0xff] %vm143_vm0, %v2931_v52  ;;  %v2235_v53 = vpop.trf.xlu0 }
 0x9c4   :  { %2936 = vtanh.f32 %v2235_v53 }
 0x9c6   :  { %v2933_v54 = vpop.eup %2932 }
 0x9c7   :  { %2265 = vst.msk [vmem:[%s3766_s19 + $0x38] sm:$0xff] %vm143_vm0, %v2933_v54  ;;  %v2236_v55 = vpop.trf.xlu0 }
 0x9c8   :  { %2938 = vtanh.f32 %v2236_v55 }
 0x9ca   :  { %v2935_v56 = vpop.eup %2934 }
 0x9cb   :  { %2266 = vst.msk [vmem:[%s3766_s19 + $0x40] sm:$0xff] %vm143_vm0, %v2935_v56  ;;  %v2237_v57 = vpop.trf.xlu0 }
 0x9cc   :  { %2940 = vtanh.f32 %v2237_v57 }
 0x9ce   :  { %v2937_v58 = vpop.eup %2936 }
 0x9cf   :  { %2267 = vst.msk [vmem:[%s3766_s19 + $0x48] sm:$0xff] %vm143_vm0, %v2937_v58  ;;  %v2238_v59 = vpop.trf.xlu0 }
 0x9d0   :  { %2942 = vtanh.f32 %v2238_v59 }
 0x9d2   :  { %v2939_v60 = vpop.eup %2938 }
 0x9d3   :  { %2268 = vst.msk [vmem:[%s3766_s19 + $0x50] sm:$0xff] %vm143_vm0, %v2939_v60  ;;  %v2239_v61 = vpop.trf.xlu0 }
 0x9d4   :  { %2944 = vtanh.f32 %v2239_v61 }
 0x9d6   :  { %v2941_v62 = vpop.eup %2940 }
 0x9d7   :  { %2269 = vst.msk [vmem:[%s3766_s19 + $0x58] sm:$0xff] %vm143_vm0, %v2941_v62  ;;  %v2240_v63 = vpop.trf.xlu0 }
 0x9d8   :  { %2946 = vtanh.f32 %v2240_v63 }
 0x9da   :  { %v2943_v1 = vpop.eup %2942 }
 0x9db   :  { %2270 = vst.msk [vmem:[%s3766_s19 + $0x60] sm:$0xff] %vm143_vm0, %v2943_v1  ;;  %v2241_v2 = vpop.trf.xlu0 }
 0x9dc   :  { %2948 = vtanh.f32 %v2241_v2 }
 0x9de   :  { %v2945_v3 = vpop.eup %2944 }
 0x9df   :  { %2271 = vst.msk [vmem:[%s3766_s19 + $0x68] sm:$0xff] %vm143_vm0, %v2945_v3 }
 0x9e2   :  { %v2947_v4 = vpop.eup %2946 }
 0x9e3   :  { %2272 = vst.msk [vmem:[%s3766_s19 + $0x70] sm:$0xff] %vm143_vm0, %v2947_v4 }
 0x9e6   :  { %v2949_v5 = vpop.eup %2948 }
 0x9e7   :  { %2273 = vst.msk [vmem:[%s3766_s19 + $0x78] sm:$0xff] %vm143_vm0, %v2949_v5 }

</bundles_post_ra>
